<compile_context>
chip_gen: v7x
topology: tpu7x:2x2x1
jax: 0.10.0
libtpu: 0.0.40
codegen_flags: <defaults>
</compile_context>

<pallas_src>
import math
import jax
import jax.numpy as jnp
from jax.experimental import pallas as pl
from jax.experimental.pallas import tpu as pltpu

# ------------------------- config (small, consistent with the module) -------------------------
DIM = 64
N_HEADS = 4
N_KV_HEADS = 2
HEAD_DIM = DIM // N_HEADS            # 16
HALF = HEAD_DIM // 2                 # 8
N_REP = N_HEADS // N_KV_HEADS        # 2
MULTIPLE_OF = 32
NORM_EPS = 1e-5
BATCH = 2
SEQ = 8

QW = N_HEADS * HEAD_DIM              # 64
KW = N_KV_HEADS * HEAD_DIM           # 32


def _mlp_hidden(dim, multiple_of):
    hidden = 4 * dim
    hidden = int(2 * hidden / 3)
    return multiple_of * ((hidden + multiple_of - 1) // multiple_of)


HIDDEN_DIM = _mlp_hidden(DIM, MULTIPLE_OF)   # 192


# ------------------------------------ fused Pallas kernel -------------------------------------
def _rmsnorm(t, w):
    ms = jnp.mean(t * t, axis=-1, keepdims=True)
    return (t * jax.lax.rsqrt(ms + NORM_EPS)) * w


def _decoder_layer_kernel(x_ref, wqkv_ref, wo_ref, w13_ref, w2_ref,
                          anw_ref, fnw_ref, cos_ref, sin_ref, bias_ref, o_ref):
    x = x_ref[...]                    # (R, D) f32 rows (batch*seq flattened by the wrapper)
    cos = cos_ref[...]                # (R, HALF) f32 rotary tables (per-row)
    sin = sin_ref[...]                # (R, HALF)

    # ---- attention block: h = x + Wo( softmax(q k^T + bias) v ) ----
    xn = _rmsnorm(x, anw_ref[...]).astype(jnp.bfloat16)
    qkv = jnp.dot(xn, wqkv_ref[...], preferred_element_type=jnp.float32)   # (R, 128), 1 MXU push
    xq = qkv[:, :QW]                         # (R, 64) half-rotation layout, scale pre-folded
    xk = qkv[:, QW:QW + KW]                  # (R, 32) half-rotation layout
    xv = qkv[:, QW + KW:].astype(jnp.bfloat16)   # (R, 32) original layout

    def rope(t):
        # t: (R, HEAD_DIM) in [real | imag] half layout; exact f32 rotation, then bf16 for MXU.
        r, i = t[:, :HALF], t[:, HALF:]
        return jnp.concatenate([r * cos - i * sin, r * sin + i * cos],
                               axis=-1).astype(jnp.bfloat16)

    k_rot = [rope(xk[:, kv * HEAD_DIM:(kv + 1) * HEAD_DIM]) for kv in range(N_KV_HEADS)]
    bias = bias_ref[...]                     # (R, R) additive causal mask (0 / -1e30)

    head_outs = []
    for h in range(N_HEADS):
        kv = h // N_REP                      # GQA: static KV-head reuse, no repeat
        q_rot = rope(xq[:, h * HEAD_DIM:(h + 1) * HEAD_DIM])
        scores = jax.lax.dot_general(        # q @ k^T without explicit transpose
            q_rot, k_rot[kv], (((1,), (1,)), ((), ())),
            preferred_element_type=jnp.float32) + bias
        m = jnp.max(scores, axis=-1, keepdims=True)
        p = jnp.exp(scores - m)
        denom = jnp.sum(p, axis=-1, keepdims=True)
        p = (p * pl.reciprocal(denom, approx=True)).astype(jnp.bfloat16)   # EUP reciprocal
        head_outs.append(jnp.dot(p, xv[:, kv * HEAD_DIM:(kv + 1) * HEAD_DIM],
                                 preferred_element_type=jnp.float32))
    attn = jnp.concatenate(head_outs, axis=-1).astype(jnp.bfloat16)        # (R, 64) lane-dense
    h_res = x + jnp.dot(attn, wo_ref[...], preferred_element_type=jnp.float32)   # residual 1

    # ---- feed-forward block: out = h + W2( silu(W1 hn) * W3 hn ),  W1|W3 fused ----
    hn = _rmsnorm(h_res, fnw_ref[...]).astype(jnp.bfloat16)
    h13 = jnp.dot(hn, w13_ref[...], preferred_element_type=jnp.float32)    # (R, 384), 1 push
    h1, h3 = h13[:, :HIDDEN_DIM], h13[:, HIDDEN_DIM:]
    act = (h1 * jax.nn.sigmoid(h1) * h3).astype(jnp.bfloat16)
    ff = jnp.dot(act, w2_ref[...], preferred_element_type=jnp.float32)
    o_ref[...] = h_res + ff


# -------------------------------- wrapper-side weight preparation -----------------------------
def _half_rotation_cols(n_heads, head_dim):
    """Column permutation per head: [even lanes (real) | odd lanes (imag)]."""
    half = head_dim // 2
    idx = []
    for h in range(n_heads):
        base = h * head_dim
        idx += [base + 2 * i for i in range(half)]
        idx += [base + 2 * i + 1 for i in range(half)]
    return jnp.asarray(idx, dtype=jnp.int32)


def prepare_fused_weights(params):
    """One-time prep: QKV / W1|W3 fusion, RoPE column permutation of wq/wk (q.k invariant),
    softmax scale folded into wq, bf16 weight casts."""
    scale = 1.0 / math.sqrt(HEAD_DIM)
    wq = params["wq"][:, _half_rotation_cols(N_HEADS, HEAD_DIM)] * scale
    wk = params["wk"][:, _half_rotation_cols(N_KV_HEADS, HEAD_DIM)]
    wqkv = jnp.concatenate([wq, wk, params["wv"]], axis=1).astype(jnp.bfloat16)     # (D, 128)
    w13 = jnp.concatenate([params["w1"], params["w3"]], axis=1).astype(jnp.bfloat16)  # (D, 384)
    return dict(
        wqkv=wqkv,
        wo=params["wo"].astype(jnp.bfloat16),
        w13=w13,
        w2=params["w2"].astype(jnp.bfloat16),
        anw=params["attn_norm_w"].reshape(1, DIM).astype(jnp.float32),
        fnw=params["ffn_norm_w"].reshape(1, DIM).astype(jnp.float32),
    )


def _batch_grid_steps(batch):
    # v7x has 2 TensorCores -> one batch element per core; v5e/v6e have 1 TC -> collapse grid.
    try:
        kind = jax.devices()[0].device_kind.lower()
    except Exception:
        return 1
    return batch if ("v7" in kind or "tpu7" in kind) else 1


# ---------------------------------- decoder layer forward -------------------------------------
def decoder_layer_forward(x, freqs_cos, freqs_sin, fused, grid_steps=None):
    B, S, D = x.shape
    if grid_steps is None:
        grid_steps = _batch_grid_steps(B)
    BB = B // grid_steps            # batch elements per kernel invocation
    R = BB * S                      # flattened rows per invocation

    x2 = x.reshape(B * S, D)
    cos = jnp.tile(freqs_cos.astype(jnp.float32), (BB, 1))         # (R, HALF)
    sin = jnp.tile(freqs_sin.astype(jnp.float32), (BB, 1))
    # additive block-diagonal causal bias over the flattened rows of one invocation
    r = jnp.arange(R)
    ok = (r[:, None] // S == r[None, :] // S) & (r[None, :] % S <= r[:, None] % S)
    bias = jnp.where(ok, 0.0, -1e30).astype(jnp.float32)           # (R, R)

    out = pl.pallas_call(
        _decoder_layer_kernel,
        grid=(grid_steps,),
        out_shape=jax.ShapeDtypeStruct((B * S, D), jnp.float32),
        in_specs=[
            pl.BlockSpec((R, D), lambda b: (b, 0)),                      # x rows
            pl.BlockSpec((D, QW + 2 * KW), lambda b: (0, 0)),            # wq|wk|wv (64, 128)
            pl.BlockSpec((QW, D), lambda b: (0, 0)),                     # wo
            pl.BlockSpec((D, 2 * HIDDEN_DIM), lambda b: (0, 0)),         # w1|w3 (64, 384)
            pl.BlockSpec((HIDDEN_DIM, D), lambda b: (0, 0)),             # w2
            pl.BlockSpec((1, D), lambda b: (0, 0)),                      # attn norm weight
            pl.BlockSpec((1, D), lambda b: (0, 0)),                      # ffn norm weight
            pl.BlockSpec((R, HALF), lambda b: (0, 0)),                   # rotary cos
            pl.BlockSpec((R, HALF), lambda b: (0, 0)),                   # rotary sin
            pl.BlockSpec((R, R), lambda b: (0, 0)),                      # causal bias
        ],
        out_specs=pl.BlockSpec((R, D), lambda b: (b, 0)),
        compiler_params=pltpu.CompilerParams(
            dimension_semantics=("parallel",),   # 2-way megacore split on v7x; 1 step elsewhere
        ),
    )(x2, fused["wqkv"], fused["wo"], fused["w13"], fused["w2"],
      fused["anw"], fused["fnw"], cos, sin, bias)
    return out.reshape(B, S, D)


# ------------------------------------- pure-JAX reference -------------------------------------
def ref_decoder_layer(x, freqs_cos, freqs_sin, params):
    B, S, D = x.shape
    Hq, Hkv, Dh = N_HEADS, N_KV_HEADS, HEAD_DIM
    n_rep = Hq // Hkv

    def rms(t, w):
        ms = jnp.mean(t * t, axis=-1, keepdims=True)
        return t * jax.lax.rsqrt(ms + NORM_EPS) * w

    def rope(t):  # t: (B, S, H, Dh), interleaved pairs
        tr, ti = t[..., 0::2], t[..., 1::2]
        c = freqs_cos[None, :, None, :]
        s = freqs_sin[None, :, None, :]
        orr = tr * c - ti * s
        oii = tr * s + ti * c
        return jnp.stack([orr, oii], axis=-1).reshape(t.shape)

    xn = rms(x, params["attn_norm_w"])
    xq = (xn @ params["wq"]).reshape(B, S, Hq, Dh)
    xk = (xn @ params["wk"]).reshape(B, S, Hkv, Dh)
    xv = (xn @ params["wv"]).reshape(B, S, Hkv, Dh)
    xq, xk = rope(xq), rope(xk)
    xk = jnp.repeat(xk, n_rep, axis=2)
    xv = jnp.repeat(xv, n_rep, axis=2)
    q = xq.transpose(0, 2, 1, 3)
    k = xk.transpose(0, 2, 1, 3)
    v = xv.transpose(0, 2, 1, 3)
    scores = q @ k.transpose(0, 1, 3, 2) / math.sqrt(Dh)
    causal = jnp.tril(jnp.ones((S, S), bool))
    scores = jnp.where(causal[None, None], scores, -jnp.inf)
    p = jax.nn.softmax(scores, axis=-1)
    out = (p @ v).transpose(0, 2, 1, 3).reshape(B, S, Hq * Dh)
    h = x + out @ params["wo"]
    hn = rms(h, params["ffn_norm_w"])
    h1 = hn @ params["w1"]
    h3 = hn @ params["w3"]
    ff = (h1 * jax.nn.sigmoid(h1) * h3) @ params["w2"]
    return h + ff


# -------------------------------------------- main ---------------------------------------------
if __name__ == "__main__":
    key = jax.random.PRNGKey(0)
    keys = jax.random.split(key, 12)

    params = {
        "wq": 0.05 * jax.random.normal(keys[0], (DIM, N_HEADS * HEAD_DIM), jnp.float32),
        "wk": 0.05 * jax.random.normal(keys[1], (DIM, N_KV_HEADS * HEAD_DIM), jnp.float32),
        "wv": 0.05 * jax.random.normal(keys[2], (DIM, N_KV_HEADS * HEAD_DIM), jnp.float32),
        "wo": 0.05 * jax.random.normal(keys[3], (N_HEADS * HEAD_DIM, DIM), jnp.float32),
        "w1": 0.05 * jax.random.normal(keys[4], (DIM, HIDDEN_DIM), jnp.float32),
        "w3": 0.05 * jax.random.normal(keys[5], (DIM, HIDDEN_DIM), jnp.float32),
        "w2": 0.05 * jax.random.normal(keys[6], (HIDDEN_DIM, DIM), jnp.float32),
        "attn_norm_w": 1.0 + 0.1 * jax.random.normal(keys[7], (DIM,), jnp.float32),
        "ffn_norm_w": 1.0 + 0.1 * jax.random.normal(keys[8], (DIM,), jnp.float32),
    }

    x = jax.random.normal(keys[9], (BATCH, SEQ, DIM), jnp.float32)

    # precompute rotary frequencies, shape (S, head_dim // 2), as in LLaMA
    inv_freq = 1.0 / (10000.0 ** (jnp.arange(0, HEAD_DIM, 2, dtype=jnp.float32) / HEAD_DIM))
    t = jnp.arange(SEQ, dtype=jnp.float32)
    freqs = jnp.outer(t, inv_freq)                 # (S, Dh/2)
    freqs_cos = jnp.cos(freqs)
    freqs_sin = jnp.sin(freqs)

    fused = prepare_fused_weights(params)
    fwd = jax.jit(decoder_layer_forward, static_argnames=("grid_steps",))
    out = fwd(x, freqs_cos, freqs_sin, fused)
    out = jax.block_until_ready(out)

    # Gold reference in full f32 precision; the kernel uses bf16 weights / MXU inputs (f32
    # accumulation) plus an approximate EUP reciprocal in softmax, so tolerance is 1e-2.
    with jax.default_matmul_precision("highest"):
        ref = ref_decoder_layer(x, freqs_cos, freqs_sin, params)
    if not jnp.allclose(out, ref, atol=1e-2, rtol=1e-2):
        err = float(jnp.max(jnp.abs(out - ref)))
        raise AssertionError(f"Pallas decoder layer does not match reference (max abs err {err})")

    print("KERNEL_OK")
</pallas_src>

<mosaic_0001>
module attributes {stable_mosaic.version = 11 : i64} {
  func.func @_decoder_layer_kernel(%arg0: i32, %arg1: memref<16x64xf32, #tpu.memory_space<vmem>>, %arg2: memref<64x128xbf16, #tpu.memory_space<vmem>>, %arg3: memref<64x64xbf16, #tpu.memory_space<vmem>>, %arg4: memref<64x384xbf16, #tpu.memory_space<vmem>>, %arg5: memref<192x64xbf16, #tpu.memory_space<vmem>>, %arg6: memref<1x64xf32, #tpu.memory_space<vmem>>, %arg7: memref<1x64xf32, #tpu.memory_space<vmem>>, %arg8: memref<16x8xf32, #tpu.memory_space<vmem>>, %arg9: memref<16x8xf32, #tpu.memory_space<vmem>>, %arg10: memref<16x16xf32, #tpu.memory_space<vmem>>, %arg11: memref<16x64xf32, #tpu.memory_space<vmem>>) attributes {dimension_semantics = [#tpu.dimension_semantics<parallel>], iteration_bounds = array<i64: 1>, scalar_prefetch = 0 : i64, scratch_operands = 0 : i64, tpu.core_type = #tpu.core_type<tc>, window_params = [{transform_indices = @transform_0, window_bounds = array<i64: 16, 64>}, {pipeline_mode = #tpu.pipeline_mode<synchronous>, transform_indices = @transform_1, window_bounds = array<i64: 64, 128>}, {pipeline_mode = #tpu.pipeline_mode<synchronous>, transform_indices = @transform_2, window_bounds = array<i64: 64, 64>}, {pipeline_mode = #tpu.pipeline_mode<synchronous>, transform_indices = @transform_3, window_bounds = array<i64: 64, 384>}, {pipeline_mode = #tpu.pipeline_mode<synchronous>, transform_indices = @transform_4, window_bounds = array<i64: 192, 64>}, {pipeline_mode = #tpu.pipeline_mode<synchronous>, transform_indices = @transform_5, window_bounds = array<i64: 1, 64>}, {pipeline_mode = #tpu.pipeline_mode<synchronous>, transform_indices = @transform_6, window_bounds = array<i64: 1, 64>}, {pipeline_mode = #tpu.pipeline_mode<synchronous>, transform_indices = @transform_7, window_bounds = array<i64: 16, 8>}, {pipeline_mode = #tpu.pipeline_mode<synchronous>, transform_indices = @transform_8, window_bounds = array<i64: 16, 8>}, {pipeline_mode = #tpu.pipeline_mode<synchronous>, transform_indices = @transform_9, window_bounds = array<i64: 16, 16>}, {transform_indices = @transform_10, window_bounds = array<i64: 16, 64>}]} {
    %c0 = arith.constant 0 : index
    %c0_0 = arith.constant 0 : index
    %0 = vector.load %arg1[%c0, %c0_0] : memref<16x64xf32, #tpu.memory_space<vmem>>, vector<16x64xf32>
    %c0_1 = arith.constant 0 : index
    %c0_2 = arith.constant 0 : index
    %1 = vector.load %arg8[%c0_1, %c0_2] : memref<16x8xf32, #tpu.memory_space<vmem>>, vector<16x8xf32>
    %c0_3 = arith.constant 0 : index
    %c0_4 = arith.constant 0 : index
    %2 = vector.load %arg9[%c0_3, %c0_4] : memref<16x8xf32, #tpu.memory_space<vmem>>, vector<16x8xf32>
    %c0_5 = arith.constant 0 : index
    %c0_6 = arith.constant 0 : index
    %3 = vector.load %arg6[%c0_5, %c0_6] : memref<1x64xf32, #tpu.memory_space<vmem>>, vector<1x64xf32>
    %4 = arith.mulf %0, %0 : vector<16x64xf32>
    %cst = arith.constant dense<0.000000e+00> : vector<16xf32>
    %5 = vector.multi_reduction <add>, %4, %cst [1] : vector<16x64xf32> to vector<16xf32>
    %6 = vector.shape_cast %5 : vector<16xf32> to vector<16x1xf32>
    %cst_7 = arith.constant 6.400000e+01 : f32
    %7 = vector.broadcast %cst_7 : f32 to vector<16x1xf32>
    %8 = arith.divf %6, %7 : vector<16x1xf32>
    %cst_8 = arith.constant 9.99999974E-6 : f32
    %9 = vector.broadcast %cst_8 : f32 to vector<16x1xf32>
    %10 = arith.addf %8, %9 : vector<16x1xf32>
    %11 = math.rsqrt %10 : vector<16x1xf32>
    %12 = vector.broadcast %11 : vector<16x1xf32> to vector<16x64xf32>
    %13 = arith.mulf %0, %12 : vector<16x64xf32>
    %14 = vector.broadcast %3 : vector<1x64xf32> to vector<16x64xf32>
    %15 = arith.mulf %13, %14 : vector<16x64xf32>
    %16 = arith.truncf %15 : vector<16x64xf32> to vector<16x64xbf16>
    %c0_9 = arith.constant 0 : index
    %c0_10 = arith.constant 0 : index
    %17 = vector.load %arg2[%c0_9, %c0_10] : memref<64x128xbf16, #tpu.memory_space<vmem>>, vector<64x128xbf16>
    %cst_11 = arith.constant dense<0.000000e+00> : vector<16x128xf32>
    %18 = tpu.matmul %16, %17, %cst_11 {dimension_numbers = #tpu.dot_dimension_numbers<[1], [0], [0], [1], [0, 0, 1, 1], [], []>} : vector<16x64xbf16>, vector<64x128xbf16>, vector<16x128xf32> -> vector<16x128xf32>
    %19 = vector.extract_strided_slice %18 {offsets = [0, 0], sizes = [16, 64], strides = [1, 1]} : vector<16x128xf32> to vector<16x64xf32>
    %20 = vector.extract_strided_slice %18 {offsets = [0, 64], sizes = [16, 32], strides = [1, 1]} : vector<16x128xf32> to vector<16x32xf32>
    %21 = vector.extract_strided_slice %18 {offsets = [0, 96], sizes = [16, 32], strides = [1, 1]} : vector<16x128xf32> to vector<16x32xf32>
    %22 = arith.truncf %21 : vector<16x32xf32> to vector<16x32xbf16>
    %23 = vector.extract_strided_slice %20 {offsets = [0, 0], sizes = [16, 16], strides = [1, 1]} : vector<16x32xf32> to vector<16x16xf32>
    %24 = vector.extract_strided_slice %23 {offsets = [0, 0], sizes = [16, 8], strides = [1, 1]} : vector<16x16xf32> to vector<16x8xf32>
    %25 = vector.extract_strided_slice %23 {offsets = [0, 8], sizes = [16, 8], strides = [1, 1]} : vector<16x16xf32> to vector<16x8xf32>
    %26 = arith.mulf %24, %1 : vector<16x8xf32>
    %27 = arith.mulf %25, %2 : vector<16x8xf32>
    %28 = arith.subf %26, %27 : vector<16x8xf32>
    %29 = arith.mulf %24, %2 : vector<16x8xf32>
    %30 = arith.mulf %25, %1 : vector<16x8xf32>
    %31 = arith.addf %29, %30 : vector<16x8xf32>
    %32 = tpu.concatenate %28, %31 in 1 : vector<16x8xf32>, vector<16x8xf32> -> vector<16x16xf32>
    %33 = arith.truncf %32 : vector<16x16xf32> to vector<16x16xbf16>
    %34 = vector.extract_strided_slice %20 {offsets = [0, 16], sizes = [16, 16], strides = [1, 1]} : vector<16x32xf32> to vector<16x16xf32>
    %35 = vector.extract_strided_slice %34 {offsets = [0, 0], sizes = [16, 8], strides = [1, 1]} : vector<16x16xf32> to vector<16x8xf32>
    %36 = vector.extract_strided_slice %34 {offsets = [0, 8], sizes = [16, 8], strides = [1, 1]} : vector<16x16xf32> to vector<16x8xf32>
    %37 = arith.mulf %35, %1 : vector<16x8xf32>
    %38 = arith.mulf %36, %2 : vector<16x8xf32>
    %39 = arith.subf %37, %38 : vector<16x8xf32>
    %40 = arith.mulf %35, %2 : vector<16x8xf32>
    %41 = arith.mulf %36, %1 : vector<16x8xf32>
    %42 = arith.addf %40, %41 : vector<16x8xf32>
    %43 = tpu.concatenate %39, %42 in 1 : vector<16x8xf32>, vector<16x8xf32> -> vector<16x16xf32>
    %44 = arith.truncf %43 : vector<16x16xf32> to vector<16x16xbf16>
    %c0_12 = arith.constant 0 : index
    %c0_13 = arith.constant 0 : index
    %45 = vector.load %arg10[%c0_12, %c0_13] : memref<16x16xf32, #tpu.memory_space<vmem>>, vector<16x16xf32>
    %46 = vector.extract_strided_slice %19 {offsets = [0, 0], sizes = [16, 16], strides = [1, 1]} : vector<16x64xf32> to vector<16x16xf32>
    %47 = vector.extract_strided_slice %46 {offsets = [0, 0], sizes = [16, 8], strides = [1, 1]} : vector<16x16xf32> to vector<16x8xf32>
    %48 = vector.extract_strided_slice %46 {offsets = [0, 8], sizes = [16, 8], strides = [1, 1]} : vector<16x16xf32> to vector<16x8xf32>
    %49 = arith.mulf %47, %1 : vector<16x8xf32>
    %50 = arith.mulf %48, %2 : vector<16x8xf32>
    %51 = arith.subf %49, %50 : vector<16x8xf32>
    %52 = arith.mulf %47, %2 : vector<16x8xf32>
    %53 = arith.mulf %48, %1 : vector<16x8xf32>
    %54 = arith.addf %52, %53 : vector<16x8xf32>
    %55 = tpu.concatenate %51, %54 in 1 : vector<16x8xf32>, vector<16x8xf32> -> vector<16x16xf32>
    %56 = arith.truncf %55 : vector<16x16xf32> to vector<16x16xbf16>
    %cst_14 = arith.constant dense<0.000000e+00> : vector<16x16xf32>
    %57 = tpu.matmul %56, %33, %cst_14 {dimension_numbers = #tpu.dot_dimension_numbers<[1], [1], [0], [0], [0, 0, 1, 0], [], []>} : vector<16x16xbf16>, vector<16x16xbf16>, vector<16x16xf32> -> vector<16x16xf32>
    %58 = arith.addf %57, %45 : vector<16x16xf32>
    %cst_15 = arith.constant dense<0xFF800000> : vector<16xf32>
    %59 = vector.multi_reduction <maximumf>, %58, %cst_15 [1] : vector<16x16xf32> to vector<16xf32>
    %60 = vector.shape_cast %59 : vector<16xf32> to vector<16x1xf32>
    %61 = vector.broadcast %60 : vector<16x1xf32> to vector<16x16xf32>
    %62 = arith.subf %58, %61 : vector<16x16xf32>
    %63 = math.exp %62 : vector<16x16xf32>
    %cst_16 = arith.constant dense<0.000000e+00> : vector<16xf32>
    %64 = vector.multi_reduction <add>, %63, %cst_16 [1] : vector<16x16xf32> to vector<16xf32>
    %65 = vector.shape_cast %64 : vector<16xf32> to vector<16x1xf32>
    %66 = tpu.reciprocal %65 {approx = true} : vector<16x1xf32> -> vector<16x1xf32>
    %67 = vector.broadcast %66 : vector<16x1xf32> to vector<16x16xf32>
    %68 = arith.mulf %63, %67 : vector<16x16xf32>
    %69 = arith.truncf %68 : vector<16x16xf32> to vector<16x16xbf16>
    %70 = vector.extract_strided_slice %22 {offsets = [0, 0], sizes = [16, 16], strides = [1, 1]} : vector<16x32xbf16> to vector<16x16xbf16>
    %cst_17 = arith.constant dense<0.000000e+00> : vector<16x16xf32>
    %71 = tpu.matmul %69, %70, %cst_17 {dimension_numbers = #tpu.dot_dimension_numbers<[1], [0], [0], [1], [0, 0, 1, 1], [], []>} : vector<16x16xbf16>, vector<16x16xbf16>, vector<16x16xf32> -> vector<16x16xf32>
    %72 = vector.extract_strided_slice %19 {offsets = [0, 16], sizes = [16, 16], strides = [1, 1]} : vector<16x64xf32> to vector<16x16xf32>
    %73 = vector.extract_strided_slice %72 {offsets = [0, 0], sizes = [16, 8], strides = [1, 1]} : vector<16x16xf32> to vector<16x8xf32>
    %74 = vector.extract_strided_slice %72 {offsets = [0, 8], sizes = [16, 8], strides = [1, 1]} : vector<16x16xf32> to vector<16x8xf32>
    %75 = arith.mulf %73, %1 : vector<16x8xf32>
    %76 = arith.mulf %74, %2 : vector<16x8xf32>
    %77 = arith.subf %75, %76 : vector<16x8xf32>
    %78 = arith.mulf %73, %2 : vector<16x8xf32>
    %79 = arith.mulf %74, %1 : vector<16x8xf32>
    %80 = arith.addf %78, %79 : vector<16x8xf32>
    %81 = tpu.concatenate %77, %80 in 1 : vector<16x8xf32>, vector<16x8xf32> -> vector<16x16xf32>
    %82 = arith.truncf %81 : vector<16x16xf32> to vector<16x16xbf16>
    %cst_18 = arith.constant dense<0.000000e+00> : vector<16x16xf32>
    %83 = tpu.matmul %82, %33, %cst_18 {dimension_numbers = #tpu.dot_dimension_numbers<[1], [1], [0], [0], [0, 0, 1, 0], [], []>} : vector<16x16xbf16>, vector<16x16xbf16>, vector<16x16xf32> -> vector<16x16xf32>
    %84 = arith.addf %83, %45 : vector<16x16xf32>
    %cst_19 = arith.constant dense<0xFF800000> : vector<16xf32>
    %85 = vector.multi_reduction <maximumf>, %84, %cst_19 [1] : vector<16x16xf32> to vector<16xf32>
    %86 = vector.shape_cast %85 : vector<16xf32> to vector<16x1xf32>
    %87 = vector.broadcast %86 : vector<16x1xf32> to vector<16x16xf32>
    %88 = arith.subf %84, %87 : vector<16x16xf32>
    %89 = math.exp %88 : vector<16x16xf32>
    %cst_20 = arith.constant dense<0.000000e+00> : vector<16xf32>
    %90 = vector.multi_reduction <add>, %89, %cst_20 [1] : vector<16x16xf32> to vector<16xf32>
    %91 = vector.shape_cast %90 : vector<16xf32> to vector<16x1xf32>
    %92 = tpu.reciprocal %91 {approx = true} : vector<16x1xf32> -> vector<16x1xf32>
    %93 = vector.broadcast %92 : vector<16x1xf32> to vector<16x16xf32>
    %94 = arith.mulf %89, %93 : vector<16x16xf32>
    %95 = arith.truncf %94 : vector<16x16xf32> to vector<16x16xbf16>
    %96 = vector.extract_strided_slice %22 {offsets = [0, 0], sizes = [16, 16], strides = [1, 1]} : vector<16x32xbf16> to vector<16x16xbf16>
    %cst_21 = arith.constant dense<0.000000e+00> : vector<16x16xf32>
    %97 = tpu.matmul %95, %96, %cst_21 {dimension_numbers = #tpu.dot_dimension_numbers<[1], [0], [0], [1], [0, 0, 1, 1], [], []>} : vector<16x16xbf16>, vector<16x16xbf16>, vector<16x16xf32> -> vector<16x16xf32>
    %98 = vector.extract_strided_slice %19 {offsets = [0, 32], sizes = [16, 16], strides = [1, 1]} : vector<16x64xf32> to vector<16x16xf32>
    %99 = vector.extract_strided_slice %98 {offsets = [0, 0], sizes = [16, 8], strides = [1, 1]} : vector<16x16xf32> to vector<16x8xf32>
    %100 = vector.extract_strided_slice %98 {offsets = [0, 8], sizes = [16, 8], strides = [1, 1]} : vector<16x16xf32> to vector<16x8xf32>
    %101 = arith.mulf %99, %1 : vector<16x8xf32>
    %102 = arith.mulf %100, %2 : vector<16x8xf32>
    %103 = arith.subf %101, %102 : vector<16x8xf32>
    %104 = arith.mulf %99, %2 : vector<16x8xf32>
    %105 = arith.mulf %100, %1 : vector<16x8xf32>
    %106 = arith.addf %104, %105 : vector<16x8xf32>
    %107 = tpu.concatenate %103, %106 in 1 : vector<16x8xf32>, vector<16x8xf32> -> vector<16x16xf32>
    %108 = arith.truncf %107 : vector<16x16xf32> to vector<16x16xbf16>
    %cst_22 = arith.constant dense<0.000000e+00> : vector<16x16xf32>
    %109 = tpu.matmul %108, %44, %cst_22 {dimension_numbers = #tpu.dot_dimension_numbers<[1], [1], [0], [0], [0, 0, 1, 0], [], []>} : vector<16x16xbf16>, vector<16x16xbf16>, vector<16x16xf32> -> vector<16x16xf32>
    %110 = arith.addf %109, %45 : vector<16x16xf32>
    %cst_23 = arith.constant dense<0xFF800000> : vector<16xf32>
    %111 = vector.multi_reduction <maximumf>, %110, %cst_23 [1] : vector<16x16xf32> to vector<16xf32>
    %112 = vector.shape_cast %111 : vector<16xf32> to vector<16x1xf32>
    %113 = vector.broadcast %112 : vector<16x1xf32> to vector<16x16xf32>
    %114 = arith.subf %110, %113 : vector<16x16xf32>
    %115 = math.exp %114 : vector<16x16xf32>
    %cst_24 = arith.constant dense<0.000000e+00> : vector<16xf32>
    %116 = vector.multi_reduction <add>, %115, %cst_24 [1] : vector<16x16xf32> to vector<16xf32>
    %117 = vector.shape_cast %116 : vector<16xf32> to vector<16x1xf32>
    %118 = tpu.reciprocal %117 {approx = true} : vector<16x1xf32> -> vector<16x1xf32>
    %119 = vector.broadcast %118 : vector<16x1xf32> to vector<16x16xf32>
    %120 = arith.mulf %115, %119 : vector<16x16xf32>
    %121 = arith.truncf %120 : vector<16x16xf32> to vector<16x16xbf16>
    %122 = vector.extract_strided_slice %22 {offsets = [0, 16], sizes = [16, 16], strides = [1, 1]} : vector<16x32xbf16> to vector<16x16xbf16>
    %cst_25 = arith.constant dense<0.000000e+00> : vector<16x16xf32>
    %123 = tpu.matmul %121, %122, %cst_25 {dimension_numbers = #tpu.dot_dimension_numbers<[1], [0], [0], [1], [0, 0, 1, 1], [], []>} : vector<16x16xbf16>, vector<16x16xbf16>, vector<16x16xf32> -> vector<16x16xf32>
    %124 = vector.extract_strided_slice %19 {offsets = [0, 48], sizes = [16, 16], strides = [1, 1]} : vector<16x64xf32> to vector<16x16xf32>
    %125 = vector.extract_strided_slice %124 {offsets = [0, 0], sizes = [16, 8], strides = [1, 1]} : vector<16x16xf32> to vector<16x8xf32>
    %126 = vector.extract_strided_slice %124 {offsets = [0, 8], sizes = [16, 8], strides = [1, 1]} : vector<16x16xf32> to vector<16x8xf32>
    %127 = arith.mulf %125, %1 : vector<16x8xf32>
    %128 = arith.mulf %126, %2 : vector<16x8xf32>
    %129 = arith.subf %127, %128 : vector<16x8xf32>
    %130 = arith.mulf %125, %2 : vector<16x8xf32>
    %131 = arith.mulf %126, %1 : vector<16x8xf32>
    %132 = arith.addf %130, %131 : vector<16x8xf32>
    %133 = tpu.concatenate %129, %132 in 1 : vector<16x8xf32>, vector<16x8xf32> -> vector<16x16xf32>
    %134 = arith.truncf %133 : vector<16x16xf32> to vector<16x16xbf16>
    %cst_26 = arith.constant dense<0.000000e+00> : vector<16x16xf32>
    %135 = tpu.matmul %134, %44, %cst_26 {dimension_numbers = #tpu.dot_dimension_numbers<[1], [1], [0], [0], [0, 0, 1, 0], [], []>} : vector<16x16xbf16>, vector<16x16xbf16>, vector<16x16xf32> -> vector<16x16xf32>
    %136 = arith.addf %135, %45 : vector<16x16xf32>
    %cst_27 = arith.constant dense<0xFF800000> : vector<16xf32>
    %137 = vector.multi_reduction <maximumf>, %136, %cst_27 [1] : vector<16x16xf32> to vector<16xf32>
    %138 = vector.shape_cast %137 : vector<16xf32> to vector<16x1xf32>
    %139 = vector.broadcast %138 : vector<16x1xf32> to vector<16x16xf32>
    %140 = arith.subf %136, %139 : vector<16x16xf32>
    %141 = math.exp %140 : vector<16x16xf32>
    %cst_28 = arith.constant dense<0.000000e+00> : vector<16xf32>
    %142 = vector.multi_reduction <add>, %141, %cst_28 [1] : vector<16x16xf32> to vector<16xf32>
    %143 = vector.shape_cast %142 : vector<16xf32> to vector<16x1xf32>
    %144 = tpu.reciprocal %143 {approx = true} : vector<16x1xf32> -> vector<16x1xf32>
    %145 = vector.broadcast %144 : vector<16x1xf32> to vector<16x16xf32>
    %146 = arith.mulf %141, %145 : vector<16x16xf32>
    %147 = arith.truncf %146 : vector<16x16xf32> to vector<16x16xbf16>
    %148 = vector.extract_strided_slice %22 {offsets = [0, 16], sizes = [16, 16], strides = [1, 1]} : vector<16x32xbf16> to vector<16x16xbf16>
    %cst_29 = arith.constant dense<0.000000e+00> : vector<16x16xf32>
    %149 = tpu.matmul %147, %148, %cst_29 {dimension_numbers = #tpu.dot_dimension_numbers<[1], [0], [0], [1], [0, 0, 1, 1], [], []>} : vector<16x16xbf16>, vector<16x16xbf16>, vector<16x16xf32> -> vector<16x16xf32>
    %150 = tpu.concatenate %71, %97, %123, %149 in 1 : vector<16x16xf32>, vector<16x16xf32>, vector<16x16xf32>, vector<16x16xf32> -> vector<16x64xf32>
    %151 = arith.truncf %150 : vector<16x64xf32> to vector<16x64xbf16>
    %c0_30 = arith.constant 0 : index
    %c0_31 = arith.constant 0 : index
    %152 = vector.load %arg3[%c0_30, %c0_31] : memref<64x64xbf16, #tpu.memory_space<vmem>>, vector<64x64xbf16>
    %cst_32 = arith.constant dense<0.000000e+00> : vector<16x64xf32>
    %153 = tpu.matmul %151, %152, %cst_32 {dimension_numbers = #tpu.dot_dimension_numbers<[1], [0], [0], [1], [0, 0, 1, 1], [], []>} : vector<16x64xbf16>, vector<64x64xbf16>, vector<16x64xf32> -> vector<16x64xf32>
    %154 = arith.addf %0, %153 : vector<16x64xf32>
    %c0_33 = arith.constant 0 : index
    %c0_34 = arith.constant 0 : index
    %155 = vector.load %arg7[%c0_33, %c0_34] : memref<1x64xf32, #tpu.memory_space<vmem>>, vector<1x64xf32>
    %156 = arith.mulf %154, %154 : vector<16x64xf32>
    %cst_35 = arith.constant dense<0.000000e+00> : vector<16xf32>
    %157 = vector.multi_reduction <add>, %156, %cst_35 [1] : vector<16x64xf32> to vector<16xf32>
    %158 = vector.shape_cast %157 : vector<16xf32> to vector<16x1xf32>
    %cst_36 = arith.constant 6.400000e+01 : f32
    %159 = vector.broadcast %cst_36 : f32 to vector<16x1xf32>
    %160 = arith.divf %158, %159 : vector<16x1xf32>
    %cst_37 = arith.constant 9.99999974E-6 : f32
    %161 = vector.broadcast %cst_37 : f32 to vector<16x1xf32>
    %162 = arith.addf %160, %161 : vector<16x1xf32>
    %163 = math.rsqrt %162 : vector<16x1xf32>
    %164 = vector.broadcast %163 : vector<16x1xf32> to vector<16x64xf32>
    %165 = arith.mulf %154, %164 : vector<16x64xf32>
    %166 = vector.broadcast %155 : vector<1x64xf32> to vector<16x64xf32>
    %167 = arith.mulf %165, %166 : vector<16x64xf32>
    %168 = arith.truncf %167 : vector<16x64xf32> to vector<16x64xbf16>
    %c0_38 = arith.constant 0 : index
    %c0_39 = arith.constant 0 : index
    %169 = vector.load %arg4[%c0_38, %c0_39] : memref<64x384xbf16, #tpu.memory_space<vmem>>, vector<64x384xbf16>
    %cst_40 = arith.constant dense<0.000000e+00> : vector<16x384xf32>
    %170 = tpu.matmul %168, %169, %cst_40 {dimension_numbers = #tpu.dot_dimension_numbers<[1], [0], [0], [1], [0, 0, 1, 1], [], []>} : vector<16x64xbf16>, vector<64x384xbf16>, vector<16x384xf32> -> vector<16x384xf32>
    %171 = vector.extract_strided_slice %170 {offsets = [0, 0], sizes = [16, 192], strides = [1, 1]} : vector<16x384xf32> to vector<16x192xf32>
    %172 = vector.extract_strided_slice %170 {offsets = [0, 192], sizes = [16, 192], strides = [1, 1]} : vector<16x384xf32> to vector<16x192xf32>
    %173 = arith.negf %171 : vector<16x192xf32>
    %174 = math.exp %173 : vector<16x192xf32>
    %cst_41 = arith.constant 1.000000e+00 : f32
    %175 = vector.broadcast %cst_41 : f32 to vector<16x192xf32>
    %176 = arith.addf %175, %174 : vector<16x192xf32>
    %177 = arith.divf %175, %176 : vector<16x192xf32>
    %178 = arith.mulf %171, %177 : vector<16x192xf32>
    %179 = arith.mulf %178, %172 : vector<16x192xf32>
    %180 = arith.truncf %179 : vector<16x192xf32> to vector<16x192xbf16>
    %c0_42 = arith.constant 0 : index
    %c0_43 = arith.constant 0 : index
    %181 = vector.load %arg5[%c0_42, %c0_43] : memref<192x64xbf16, #tpu.memory_space<vmem>>, vector<192x64xbf16>
    %cst_44 = arith.constant dense<0.000000e+00> : vector<16x64xf32>
    %182 = tpu.matmul %180, %181, %cst_44 {dimension_numbers = #tpu.dot_dimension_numbers<[1], [0], [0], [1], [0, 0, 1, 1], [], []>} : vector<16x192xbf16>, vector<192x64xbf16>, vector<16x64xf32> -> vector<16x64xf32>
    %183 = arith.addf %154, %182 : vector<16x64xf32>
    %c0_45 = arith.constant 0 : index
    %c0_46 = arith.constant 0 : index
    %184 = vector.load %arg11[%c0_45, %c0_46] : memref<16x64xf32, #tpu.memory_space<vmem>>, vector<16x64xf32>
    tpu.vector_store %arg11[%c0_45, %c0_46], %183 {strides = array<i32>} : memref<16x64xf32, #tpu.memory_space<vmem>>, vector<16x64xf32>,
    return
  }
  func.func @transform_0(%arg0: i32) -> (i32, i32) {
    %c0_i32 = arith.constant 0 : i32
    %c0_i32_0 = arith.constant 0 : i32
    return %arg0, %c0_i32 : i32, i32
  }
  func.func @transform_1(%arg0: i32) -> (i32, i32) {
    %c0_i32 = arith.constant 0 : i32
    %c0_i32_0 = arith.constant 0 : i32
    %c0_i32_1 = arith.constant 0 : i32
    return %c0_i32, %c0_i32_0 : i32, i32
  }
  func.func @transform_2(%arg0: i32) -> (i32, i32) {
    %c0_i32 = arith.constant 0 : i32
    %c0_i32_0 = arith.constant 0 : i32
    %c0_i32_1 = arith.constant 0 : i32
    return %c0_i32, %c0_i32_0 : i32, i32
  }
  func.func @transform_3(%arg0: i32) -> (i32, i32) {
    %c0_i32 = arith.constant 0 : i32
    %c0_i32_0 = arith.constant 0 : i32
    %c0_i32_1 = arith.constant 0 : i32
    return %c0_i32, %c0_i32_0 : i32, i32
  }
  func.func @transform_4(%arg0: i32) -> (i32, i32) {
    %c0_i32 = arith.constant 0 : i32
    %c0_i32_0 = arith.constant 0 : i32
    %c0_i32_1 = arith.constant 0 : i32
    return %c0_i32, %c0_i32_0 : i32, i32
  }
  func.func @transform_5(%arg0: i32) -> (i32, i32) {
    %c0_i32 = arith.constant 0 : i32
    %c0_i32_0 = arith.constant 0 : i32
    %c0_i32_1 = arith.constant 0 : i32
    return %c0_i32, %c0_i32_0 : i32, i32
  }
  func.func @transform_6(%arg0: i32) -> (i32, i32) {
    %c0_i32 = arith.constant 0 : i32
    %c0_i32_0 = arith.constant 0 : i32
    %c0_i32_1 = arith.constant 0 : i32
    return %c0_i32, %c0_i32_0 : i32, i32
  }
  func.func @transform_7(%arg0: i32) -> (i32, i32) {
    %c0_i32 = arith.constant 0 : i32
    %c0_i32_0 = arith.constant 0 : i32
    %c0_i32_1 = arith.constant 0 : i32
    return %c0_i32, %c0_i32_0 : i32, i32
  }
  func.func @transform_8(%arg0: i32) -> (i32, i32) {
    %c0_i32 = arith.constant 0 : i32
    %c0_i32_0 = arith.constant 0 : i32
    %c0_i32_1 = arith.constant 0 : i32
    return %c0_i32, %c0_i32_0 : i32, i32
  }
  func.func @transform_9(%arg0: i32) -> (i32, i32) {
    %c0_i32 = arith.constant 0 : i32
    %c0_i32_0 = arith.constant 0 : i32
    %c0_i32_1 = arith.constant 0 : i32
    return %c0_i32, %c0_i32_0 : i32, i32
  }
  func.func @transform_10(%arg0: i32) -> (i32, i32) {
    %c0_i32 = arith.constant 0 : i32
    %c0_i32_0 = arith.constant 0 : i32
    return %arg0, %c0_i32 : i32, i32
  }
}

</mosaic_0001>

<bundles_post_ra>
// kernel: decoder_layer_forward.1
= control target key start
LH: loop header
LB: loop body
LE: loop exit
PB: predicated region body
PF: predicated region fallthrough
CT: control target
= control target key end

     0   :  { %vm46_vm0 = vcmask 523264   ;;  %s2474_s0 = inlined_call_operand.vmem [shape: f32[16,64], index: 0, kind: input, shape index: {}]   ;;  %s2475_s1 = inlined_call_operand.vmem [shape: bf16[64,128], index: 1, kind: input, shape index: {}]   ;;  %s2476_s2 = inlined_call_operand.vmem [shape: bf16[64,64], index: 2, kind: input, shape index: {}]   ;;  %s2477_s3 = inlined_call_operand.vmem [shape: bf16[64,384], index: 3, kind: input, shape index: {}]   ;;  %s2478_s4 = inlined_call_operand.vmem [shape: bf16[192,64], index: 4, kind: input, shape index: {}]   ;;  %s2479_s5 = inlined_call_operand.vmem [shape: f32[1,64], index: 5, kind: input, shape index: {}]   ;;  %s2480_s6 = inlined_call_operand.vmem [shape: f32[1,64], index: 6, kind: input, shape index: {}]   ;;  %s2481_s7 = inlined_call_operand.vmem [shape: f32[16,8], index: 7, kind: input, shape index: {}]   ;;  %s2482_s8 = inlined_call_operand.vmem [shape: f32[16,8], index: 8, kind: input, shape index: {}]   ;;  %s2483_s9 = inlined_call_operand.vmem [shape: f32[16,16], index: 9, kind: input, shape index: {}]   ;;  %s2484_s10 = inlined_call_operand.hbm [shape: f32[16,64], index: 10, kind: output, shape index: {}]  }
   0x1   :  { %v1987_v0 = vld [vmem:[%s2474_s0] sm:$0xff]  ;;  %v1992_v1 = vld [vmem:[%s2474_s0 + $0x8] sm:$0xff] }
   0x2   :  { %v44_v2 = vmul.f32 %v1987_v0, %v1987_v0  ;;  %v45_v3 = vmul.f32 %v1992_v1, %v1992_v1 }
   0x4   :  { %v47_v4 = vsel %vm46_vm0, %v44_v2, 0.0  ;;  %v50_v5 = vsel %vm46_vm0, %v45_v3, 0.0 }
   0x5   :  { %48 = vadd.xlane.f32.xlu0 %v47_v4 }
   0x9   :  { %51 = vadd.xlane.f32.xlu0 %v50_v5 }
   0xa   :  { %15 = vsyncpa [#allocation3], 0  ;;  %v1791_v6 = vld [vmem:[%s2475_s1] sm:$0xff]   ;;  %v1909_v7 = vmov 0.0   ;;  %vm1910_vm1 = vmmov 0   ;;  %v1792_v8 = vld [vmem:[%s2475_s1 + $0x8] sm:$0xff]  }
   0xb   :  { %1617 = vmatprep.subr.bf16.mxu0 %v1909_v7  ;;  %1625 = vmatprep.mubr.msk.bf16.mxu0 %vm1910_vm1, %v1909_v7  ;;  %v1793_v9 = vld [vmem:[%s2475_s1 + $0x10] sm:$0xff]   ;;  %v1794_v10 = vld [vmem:[%s2475_s1 + $0x18] sm:$0xff]   ;;  %v2025_v11 = vld [vmem:[%s2482_s8] sm:$0xff]  ;;  %s1911_s27 = smov 72   ;;  %s1912_s13 = smov 88   ;;  %vm220_vm2 = vcmask 64512  }
   0xc   :  { %1618 = vmatpush3.bf16.msra.mxu0 %v1791_v6  ;;  %1629 = vmatprep.subr.bf16.mxu1 %v1909_v7  ;;  %v2032_v12 = vld [vmem:[%s2481_s7] sm:$0xff]  ;;  %v2037_v13 = vld [vmem:[%s2482_s8 + $0x8] sm:$0xff]  ;;  %s1913_s8 = smov 24   ;;  %s1914_s14 = smov 8   ;;  %vm348_vm3 = vcmask 130048   ;;  %vm1045_vm4 = vcmask 261120  }
   0xd   :  { %1619 = vmatprep.subr.bf16.mxu0 %v1909_v7  ;;  %1631 = vmatprep.mubr.msk.bf16.mxu1 %vm1910_vm1, %v1909_v7  ;;  %v2046_v14 = vld [vmem:[%s2481_s7 + $0x8] sm:$0xff]  ;;  %s1915_s7 = smov 40   ;;  %s1916_s15 = smov 56   ;;  %v1535_v24 = vld [vmem:[%s2479_s5] ss:$0 sm:$0xff]  ;;  %vm1048_vm5 = vcmask 392192  }
   0xe   :  { %160 = vrot.lane.b32.xlu1 %v2025_v11, %s1911_s27  ;;  %s1917_s16 = smov 64   ;;  %s1918_s17 = smov 80  }
   0xf   :  { %s1919_s18 = smov 16   ;;  %s1920_s19 = smov 32  }
  0x10   :  { %1620 = vmatpush3.bf16.msra.mxu0 %v1792_v8  ;;  %s1921_s20 = smov 48   ;;  %s1922_s5 = smov 120  }
  0x11   :  { %1621 = vmatprep.subr.bf16.mxu0 %v1909_v7  ;;  %s1923_s23 = smov 112   ;;  %s1924_s24 = smov 96  }
  0x12   :  { %162 = vrot.lane.b32.xlu1 %v2037_v13, %s1911_s27  ;;  %s1925_s25 = smov 104  }
  0x14   :  { %1622 = vmatpush3.bf16.msra.mxu0 %v1793_v9 }
  0x15   :  { %1623 = vmatprep.subr.bf16.mxu0 %v1909_v7 }
  0x16   :  { %188 = vrot.lane.b32.xlu1 %v2046_v14, %s1911_s27 }
  0x18   :  { %1624 = vmatpush3.bf16.msra.mxu0 %v1794_v10 }
  0x19   :  { %1641 = vmatprep.subr.bf16.mxu0 %v1909_v7 }
  0x1a   :  { %319 = vrot.lane.b32.xlu1 %v2032_v12, %s1914_s14 }
  0x1e   :  { %321 = vrot.lane.b32.xlu1 %v2046_v14, %s1914_s14 }
  0x1f   :  { %186 = vrot.lane.b32.xlu0 %v2032_v12, %s1911_s27 }
  0x22   :  { %232 = vrot.lane.b32.xlu1 %v2025_v11, %s1912_s13 }
  0x23   :  { %260 = vrot.lane.b32.xlu0 %v2046_v14, %s1912_s13 }
  0x26   :  { %234 = vrot.lane.b32.xlu1 %v2037_v13, %s1912_s13 }
  0x27   :  { %477 = vrot.lane.b32.xlu0 %v2037_v13, %s1913_s8 }
  0x2a   :  { %258 = vrot.lane.b32.xlu1 %v2032_v12, %s1912_s13 }
  0x2b   :  { %503 = vrot.lane.b32.xlu0 %v2046_v14, %s1913_s8 }
  0x2e   :  { %475 = vrot.lane.b32.xlu1 %v2025_v11, %s1913_s8 }
  0x2f   :  { %659 = vrot.lane.b32.xlu0 %v2037_v13, %s1915_s7 }
  0x32   :  { %501 = vrot.lane.b32.xlu1 %v2032_v12, %s1913_s8 }
  0x33   :  { %685 = vrot.lane.b32.xlu0 %v2046_v14, %s1915_s7 }
  0x36   :  { %657 = vrot.lane.b32.xlu1 %v2025_v11, %s1915_s7 }
  0x37   :  { %847 = vrot.lane.b32.xlu0 %v2037_v13, %s1916_s15 }
  0x3a   :  { %683 = vrot.lane.b32.xlu1 %v2032_v12, %s1915_s7 }
  0x3b   :  { %873 = vrot.lane.b32.xlu0 %v2046_v14, %s1916_s15 }
  0x3e   :  { %845 = vrot.lane.b32.xlu1 %v2025_v11, %s1916_s15 }
  0x3f   :  { %152 = vrot.lane.b32.xlu0 %v2046_v14, %s1917_s16 }
  0x42   :  { %871 = vrot.lane.b32.xlu1 %v2032_v12, %s1916_s15 }
  0x43   :  { %180 = vrot.lane.b32.xlu0 %v2037_v13, %s1917_s16 }
  0x46   :  { %150 = vrot.lane.b32.xlu1 %v2032_v12, %s1917_s16 }
  0x47   :  { %301 = vrot.lane.b32.xlu0 %v2037_v13, %s1914_s14 }
  0x4a   :  { %178 = vrot.lane.b32.xlu1 %v2025_v11, %s1917_s16 }
  0x4b   :  { %226 = vrot.lane.b32.xlu0 %v2046_v14, %s1918_s17 }
  0x4e   :  { %299 = vrot.lane.b32.xlu1 %v2025_v11, %s1914_s14 }
  0x4f   :  { %252 = vrot.lane.b32.xlu0 %v2037_v13, %s1918_s17 }
  0x52   :  { %224 = vrot.lane.b32.xlu1 %v2032_v12, %s1918_s17 }
  0x53   :  { %469 = vrot.lane.b32.xlu0 %v2046_v14, %s1919_s18 }
  0x56   :  { %250 = vrot.lane.b32.xlu1 %v2025_v11, %s1918_s17 }
  0x57   :  { %495 = vrot.lane.b32.xlu0 %v2037_v13, %s1919_s18 }
  0x5a   :  { %467 = vrot.lane.b32.xlu1 %v2032_v12, %s1919_s18 }
  0x5b   :  { %651 = vrot.lane.b32.xlu0 %v2046_v14, %s1920_s19 }
  0x5e   :  { %493 = vrot.lane.b32.xlu1 %v2025_v11, %s1919_s18 }
  0x5f   :  { %677 = vrot.lane.b32.xlu0 %v2037_v13, %s1920_s19 }
  0x62   :  { %649 = vrot.lane.b32.xlu1 %v2032_v12, %s1920_s19 }
  0x63   :  { %839 = vrot.lane.b32.xlu0 %v2046_v14, %s1921_s20 }
  0x66   :  { %675 = vrot.lane.b32.xlu1 %v2025_v11, %s1920_s19 }
  0x67   :  { %865 = vrot.lane.b32.xlu0 %v2037_v13, %s1921_s20 }
  0x6a   :  { %837 = vrot.lane.b32.xlu1 %v2032_v12, %s1921_s20 }
  0x6e   :  { %863 = vrot.lane.b32.xlu1 %v2025_v11, %s1921_s20 }
  0x80   :  { %v161_v29 = vpop.permute.xlu1 %160 }
  0x84   :  { %v163_v30 = vpop.permute.xlu1 %162 }
  0x88   :  { %v189_v31 = vpop.permute.xlu1 %188 }
  0x8c   :  { %v320_v32 = vpop.permute.xlu1 %319 }
  0x90   :  { %v322_v33 = vpop.permute.xlu1 %321 }
  0x92   :  { %v49_v15 = vpop.xlane.xlu0 %48 }
  0x93   :  { %v54_v16 = vmul.f32 0.015625, %v49_v15 }
  0x94   :  { %v233_v34 = vpop.permute.xlu1 %232 }
  0x95   :  { %v56_v17 = vadd.f32 1e-05, %v54_v16 }
  0x96   :  { %v52_v18 = vpop.xlane.xlu0 %51 }
  0x97   :  { %1827 = vrsqrt.f32 %v56_v17  ;;  %v55_v19 = vmul.f32 0.015625, %v52_v18 }
  0x98   :  { %v235_v35 = vpop.permute.xlu1 %234 }
  0x99   :  { %v57_v20 = vadd.f32 1e-05, %v55_v19 }
  0x9a   :  { %v187_v36 = vpop.permute.xlu0 %186 }
  0x9b   :  { %1829 = vrsqrt.f32 %v57_v20 }
  0x9c   :  { %v259_v43 = vpop.permute.xlu1 %258 }
  0x9e   :  { %v261_v45 = vpop.permute.xlu0 %260 }
  0xa0   :  { %v476_v48 = vpop.permute.xlu1 %475 }
  0xa1   :  { %v1828_v21 = vpop.eup %1827 }
  0xa2   :  { %v60_v22 = vmul.f32 %v1828_v21, %v1987_v0  ;;  %v478_v50 = vpop.permute.xlu0 %477 }
  0xa4   :  { %v68_v26 = vmul.f32 %v1535_v24, %v60_v22  ;;  %v502_v54 = vpop.permute.xlu1 %501 }
  0xa5   :  { %v1830_v23 = vpop.eup %1829 }
  0xa6   :  { %v61_v25 = vmul.f32 %v1830_v23, %v1992_v1  ;;  %v504_v56 = vpop.permute.xlu0 %503 }
  0xa8   :  { %v69_v27 = vmul.f32 %v1535_v24, %v61_v25  ;;  %v658_v59 = vpop.permute.xlu1 %657 }
  0xaa   :  { %v70_v28 = vpack.c.bf16 %v69_v27, %v68_v26  ;;  %v660_v61 = vpop.permute.xlu0 %659 }
  0xac   :  { %1626 = vmatmul.mubr.msk.bf16.vlgmr.msra.gmra.mrb[0].mxu0 %vm46_vm0, %v70_v28  ;;  %v684_v0 = vpop.permute.xlu1 %683 }
  0xad   :  { %1643 = vmatprep.mubr.msk.bf16.mxu0 %vm1910_vm1, %v1909_v7 }
  0xae   :  { %v686_v2 = vpop.permute.xlu0 %685 }
  0xb0   :  { %v846_v5 = vpop.permute.xlu1 %845 }
  0xb2   :  { %v848_v8 = vpop.permute.xlu0 %847 }
  0xb4   :  { %v872_v15 = vpop.permute.xlu1 %871 }
  0xb6   :  { %v874_v17 = vpop.permute.xlu0 %873 }
  0xb8   :  { %v151_v19 = vpop.permute.xlu1 %150 }
  0xba   :  { %v153_v20 = vpop.permute.xlu0 %152 }
  0xbc   :  { %v179_v21 = vpop.permute.xlu1 %178 }
  0xbe   :  { %v181_v22 = vpop.permute.xlu0 %180 }
  0xc0   :  { %v300_v23 = vpop.permute.xlu1 %299 }
  0xc2   :  { %v302_v24 = vpop.permute.xlu0 %301 }
  0xc4   :  { %v225_v25 = vpop.permute.xlu1 %224 }
  0xc6   :  { %v227_v26 = vpop.permute.xlu0 %226 }
  0xc8   :  { %v251_v27 = vpop.permute.xlu1 %250 }
  0xca   :  { %v253_v28 = vpop.permute.xlu0 %252 }
 0x17f   :  { %v2130_v37 = vpop.f32.mrb[0].mxu0 }
 0x180   :  { %v1627_v38 = vpop.f32.mrb[1].mxu0  ;;  %v166_v39 = vmul.f32 %v161_v29, %v2130_v37  ;;  %v192_v44 = vmul.f32 %v187_v36, %v2130_v37  ;;  %v325_v47 = vmul.f32 %v320_v32, %v2130_v37  ;;  %v238_v51 = vmul.f32 %v233_v34, %v2130_v37  ;;  %v468_v29 = vpop.permute.xlu1 %467 }
 0x181   :  { %v2133_v40 = vpop.f32.mrb[2].mxu0  ;;  %v264_v55 = vmul.f32 %v259_v43, %v2130_v37  ;;  %v481_v58 = vmul.f32 %v476_v48, %v2130_v37  ;;  %v507_v62 = vmul.f32 %v502_v54, %v2130_v37  ;;  %v663_v1 = vmul.f32 %v658_v59, %v2130_v37 }
 0x182   :  { %170 = vrot.lane.b32.xlu1 %v166_v39, %s1922_s5  ;;  %v1628_v41 = vpop.f32.mrb[3].mxu0  ;;  %v167_v42 = vmul.f32 %v163_v30, %v2133_v40  ;;  %v193_v46 = vmul.f32 %v189_v31, %v2133_v40  ;;  %v326_v49 = vmul.f32 %v322_v33, %v2133_v40  ;;  %v2149_v52 = vpack.c.bf16 %v2133_v40, %v2130_v37  ;;  %v470_v30 = vpop.permute.xlu0 %469 }
 0x183   :  { %v239_v53 = vmul.f32 %v235_v35, %v2133_v40  ;;  %v265_v57 = vmul.f32 %v261_v45, %v2133_v40  ;;  %v482_v60 = vmul.f32 %v478_v50, %v2133_v40  ;;  %v508_v63 = vmul.f32 %v504_v56, %v2133_v40 }
 0x184   :  { %172 = vrot.lane.b32.xlu0 %v167_v42, %s1922_s5  ;;  %v664_v3 = vmul.f32 %v660_v61, %v2133_v40  ;;  %v689_v4 = vmul.f32 %v684_v0, %v2130_v37  ;;  %v690_v6 = vmul.f32 %v686_v2, %v2133_v40  ;;  %v851_v9 = vmul.f32 %v846_v5, %v2130_v37  ;;  %v494_v31 = vpop.permute.xlu1 %493 }
 0x185   :  { %v852_v10 = vmul.f32 %v848_v8, %v2133_v40  ;;  %v877_v16 = vmul.f32 %v872_v15, %v2130_v37  ;;  %v878_v18 = vmul.f32 %v874_v17, %v2133_v40  ;;  %v157_v45 = vmul.f32 %v153_v20, %v2133_v40 }
 0x186   :  { %196 = vrot.lane.b32.xlu1 %v192_v44, %s1922_s5  ;;  %v496_v32 = vpop.permute.xlu0 %495  ;;  %v156_v44 = vmul.f32 %v151_v19, %v2130_v37  ;;  %v317_v59 = vmul.f32 %v2130_v37, %v2025_v11  ;;  %v305_v61 = vmul.f32 %v300_v23, %v2130_v37  ;;  %v306_v11 = vmul.f32 %v302_v24, %v2133_v40 }
 0x187   :  { %v257_v15 = vmul.f32 %v253_v28, %v2133_v40  ;;  %v499_v28 = vmul.f32 %v494_v31, %v2130_v37 }
 0x188   :  { %198 = vrot.lane.b32.xlu0 %v193_v46, %s1922_s5  ;;  %v2182_v33 = vpop.permute.xlu1 %649 }
 0x18a   :  { %329 = vrot.lane.b32.xlu1 %v325_v47, %s1922_s5  ;;  %v2184_v34 = vpop.permute.xlu0 %651 }
 0x18c   :  { %331 = vrot.lane.b32.xlu0 %v326_v49, %s1922_s5  ;;  %v2186_v35 = vpop.permute.xlu1 %675 }
 0x18e   :  { %242 = vrot.lane.b32.xlu1 %v238_v51, %s1922_s5  ;;  %v2188_v36 = vpop.permute.xlu0 %677  ;;  %v184_v51 = vmul.f32 %v179_v21, %v2130_v37  ;;  %v473_v21 = vmul.f32 %v468_v29, %v2130_v37 }
 0x190   :  { %244 = vrot.lane.b32.xlu0 %v239_v53, %s1922_s5  ;;  %v2190_v38 = vpop.permute.xlu1 %837  ;;  %v185_v53 = vmul.f32 %v181_v22, %v2133_v40  ;;  %v474_v22 = vmul.f32 %v470_v30, %v2133_v40  ;;  %v655_v30 = vmul.f32 %v2182_v33, %v2130_v37 }
 0x192   :  { %268 = vrot.lane.b32.xlu1 %v264_v55, %s1922_s5  ;;  %v2192_v39 = vpop.permute.xlu0 %839 }
 0x194   :  { %270 = vrot.lane.b32.xlu0 %v265_v57, %s1922_s5  ;;  %v2194_v41 = vpop.permute.xlu1 %863 }
 0x196   :  { %485 = vrot.lane.b32.xlu1 %v481_v58, %s1922_s5  ;;  %v2196_v42 = vpop.permute.xlu0 %865 }
 0x198   :  { %487 = vrot.lane.b32.xlu0 %v482_v60, %s1922_s5  ;;  %v318_v60 = vmul.f32 %v2133_v40, %v2037_v13 }
 0x19a   :  { %511 = vrot.lane.b32.xlu1 %v507_v62, %s1922_s5 }
 0x19c   :  { %513 = vrot.lane.b32.xlu0 %v508_v63, %s1922_s5 }
 0x19e   :  { %667 = vrot.lane.b32.xlu1 %v663_v1, %s1922_s5 }
 0x1a0   :  { %669 = vrot.lane.b32.xlu0 %v664_v3, %s1922_s5  ;;  %v230_v3 = vmul.f32 %v225_v25, %v2130_v37 }
 0x1a2   :  { %693 = vrot.lane.b32.xlu1 %v689_v4, %s1922_s5  ;;  %v231_v4 = vmul.f32 %v227_v26, %v2133_v40 }
 0x1a4   :  { %695 = vrot.lane.b32.xlu0 %v690_v6, %s1922_s5 }
 0x1a6   :  { %855 = vrot.lane.b32.xlu1 %v851_v9, %s1922_s5 }
 0x1a8   :  { %857 = vrot.lane.b32.xlu0 %v852_v10, %s1922_s5  ;;  %v256_v10 = vmul.f32 %v251_v27, %v2130_v37 }
 0x1aa   :  { %881 = vrot.lane.b32.xlu1 %v877_v16, %s1922_s5 }
 0x1ac   :  { %883 = vrot.lane.b32.xlu0 %v878_v18, %s1922_s5 }
 0x1f4   :  { %v171_v43 = vpop.permute.xlu1 %170 }
 0x1f5   :  { %v176_v47 = vsub.f32 %v156_v44, %v171_v43  ;;  %v500_v43 = vmul.f32 %v496_v32, %v2133_v40 }
 0x1f6   :  { %v173_v46 = vpop.permute.xlu0 %172 }
 0x1f7   :  { %v177_v48 = vsub.f32 %v157_v45, %v173_v46 }
 0x1f8   :  { %v197_v49 = vpop.permute.xlu1 %196 }
 0x1f9   :  { %v1721_v50 = vpack.i.bf16 %v177_v48, %v176_v47  ;;  %v202_v55 = vadd.f32 %v197_v49, %v184_v51  ;;  %v656_v48 = vmul.f32 %v2184_v34, %v2133_v40 }
 0x1fa   :  { %v199_v54 = vpop.permute.xlu0 %198 }
 0x1fb   :  { %v203_v56 = vadd.f32 %v199_v54, %v185_v53  ;;  %1722 = vrot.lane.b32.xlu1 %v1721_v50, %s1917_s16  ;;  %v681_v53 = vmul.f32 %v2186_v35, %v2130_v37  ;;  %v682_v54 = vmul.f32 %v2188_v36, %v2133_v40  ;;  %v870_v36 = vmul.f32 %v2196_v42, %v2133_v40 }
 0x1fc   :  { %v330_v57 = vpop.permute.xlu1 %329 }
 0x1fd   :  { %v1726_v58 = vpack.i.bf16 %v203_v56, %v202_v55  ;;  %v335_v63 = vadd.f32 %v330_v57, %v317_v59  ;;  %v844_v59 = vmul.f32 %v2192_v39, %v2133_v40 }
 0x1fe   :  { %v332_v62 = vpop.permute.xlu0 %331 }
 0x1ff   :  { %v336_v0 = vadd.f32 %v332_v62, %v318_v60  ;;  %309 = vrot.lane.b32.xlu1 %v305_v61, %s1922_s5  ;;  %1727 = vrot.lane.b32.xlu0 %v1726_v58, %s1911_s27  ;;  %v843_v58 = vmul.f32 %v2190_v38, %v2130_v37 }
 0x200   :  { %v243_v1 = vpop.permute.xlu1 %242 }
 0x201   :  { %v1731_v2 = vpack.i.bf16 %v336_v0, %v335_v63  ;;  %v248_v6 = vsub.f32 %v230_v3, %v243_v1  ;;  %v869_v0 = vmul.f32 %v2194_v41, %v2130_v37  ;;  %v298_v41 = vmul.f32 %v2133_v40, %v2046_v14 }
 0x202   :  { %v245_v5 = vpop.permute.xlu0 %244 }
 0x203   :  { %v249_v13 = vsub.f32 %v231_v4, %v245_v5  ;;  %311 = vrot.lane.b32.xlu0 %v306_v11, %s1922_s5  ;;  %1732 = vrot.lane.b32.xlu1 %v1731_v2, %s1914_s14 }
 0x204   :  { %v269_v8 = vpop.permute.xlu1 %268 }
 0x205   :  { %v1736_v9 = vpack.i.bf16 %v249_v13, %v248_v6  ;;  %v274_v17 = vadd.f32 %v269_v8, %v256_v10  ;;  %v297_v8 = vmul.f32 %v2130_v37, %v2032_v12 }
 0x206   :  { %v271_v16 = vpop.permute.xlu0 %270 }
 0x207   :  { %v275_v18 = vadd.f32 %v271_v16, %v257_v15  ;;  %1737 = vrot.lane.b32.xlu0 %v1736_v9, %s1921_s20 }
 0x208   :  { %v486_v19 = vpop.permute.xlu1 %485 }
 0x209   :  { %v1741_v20 = vpack.i.bf16 %v275_v18, %v274_v17  ;;  %v491_v24 = vsub.f32 %v473_v21, %v486_v19 }
 0x20a   :  { %v488_v23 = vpop.permute.xlu0 %487 }
 0x20b   :  { %v492_v25 = vsub.f32 %v474_v22, %v488_v23  ;;  %1742 = vrot.lane.b32.xlu1 %v1741_v20, %s1916_s15 }
 0x20c   :  { %v512_v26 = vpop.permute.xlu1 %511 }
 0x20d   :  { %v1746_v27 = vpack.i.bf16 %v492_v25, %v491_v24  ;;  %v517_v45 = vadd.f32 %v512_v26, %v499_v28 }
 0x20e   :  { %v514_v44 = vpop.permute.xlu0 %513 }
 0x20f   :  { %v518_v46 = vadd.f32 %v514_v44, %v500_v43  ;;  %1747 = vrot.lane.b32.xlu0 %v1746_v27, %s1923_s23 }
 0x210   :  { %v668_v47 = vpop.permute.xlu1 %667 }
 0x211   :  { %v1751_v29 = vpack.i.bf16 %v518_v46, %v517_v45  ;;  %v673_v50 = vsub.f32 %v655_v30, %v668_v47 }
 0x212   :  { %v670_v49 = vpop.permute.xlu0 %669 }
 0x213   :  { %v674_v51 = vsub.f32 %v656_v48, %v670_v49  ;;  %1752 = vrot.lane.b32.xlu1 %v1751_v29, %s1922_s5 }
 0x214   :  { %v694_v31 = vpop.permute.xlu1 %693 }
 0x215   :  { %v1756_v32 = vpack.i.bf16 %v674_v51, %v673_v50  ;;  %v699_v56 = vadd.f32 %v694_v31, %v681_v53 }
 0x216   :  { %v696_v55 = vpop.permute.xlu0 %695 }
 0x217   :  { %v700_v57 = vadd.f32 %v696_v55, %v682_v54  ;;  %1757 = vrot.lane.b32.xlu0 %v1756_v32, %s1924_s24 }
 0x218   :  { %v856_v33 = vpop.permute.xlu1 %855 }
 0x219   :  { %v1761_v34 = vpack.i.bf16 %v700_v57, %v699_v56  ;;  %v861_v61 = vsub.f32 %v843_v58, %v856_v33 }
 0x21a   :  { %v858_v60 = vpop.permute.xlu0 %857 }
 0x21b   :  { %v862_v62 = vsub.f32 %v844_v59, %v858_v60  ;;  %1762 = vrot.lane.b32.xlu1 %v1761_v34, %s1925_s25 }
 0x21c   :  { %v882_v35 = vpop.permute.xlu1 %881 }
 0x21d   :  { %v1766_v63 = vpack.i.bf16 %v862_v62, %v861_v61  ;;  %v887_v2 = vadd.f32 %v882_v35, %v869_v0 }
 0x21e   :  { %v884_v1 = vpop.permute.xlu0 %883 }
 0x21f   :  { %v888_v3 = vadd.f32 %v884_v1, %v870_v36  ;;  %1767 = vrot.lane.b32.xlu0 %v1766_v63, %s1918_s17 }
 0x221   :  { %v1771_v38 = vpack.i.bf16 %v888_v3, %v887_v2  ;;  %v295_v2 = vld [vmem:[%s2483_s9] sm:$0xff] }
 0x223   :  { %1772 = vrot.lane.b32.xlu1 %v1771_v38, %s1912_s13  ;;  %v296_v38 = vld [vmem:[%s2483_s9 + $0x8] sm:$0xff] }
 0x26d   :  { %v1723_v39 = vpop.permute.xlu1 %1722 }
 0x26e   :  { %v1725_v5 = vunpack.i.h.bf16 %v1723_v39  ;;  %v1724_v6 = vunpack.i.l.bf16 %v1723_v39 }
 0x271   :  { %v310_v4 = vpop.permute.xlu1 %309  ;;  %v1728_v11 = vpop.permute.xlu0 %1727 }
 0x272   :  { %v1730_v13 = vunpack.i.h.bf16 %v1728_v11  ;;  %v1729_v42 = vunpack.i.l.bf16 %v1728_v11  ;;  %v315_v18 = vsub.f32 %v297_v8, %v310_v4 }
 0x274   :  { %v221_v9 = vsel %vm220_vm2, %v1724_v6, %v1729_v42  ;;  %v222_v10 = vsel %vm220_vm2, %v1725_v5, %v1730_v13 }
 0x275   :  { %v1733_v15 = vpop.permute.xlu1 %1732  ;;  %v312_v16 = vpop.permute.xlu0 %311  ;;  %v223_v17 = vpack.c.bf16 %v222_v10, %v221_v9 }
 0x276   :  { %v1735_v19 = vunpack.i.h.bf16 %v1733_v15  ;;  %v1734_v20 = vunpack.i.l.bf16 %v1733_v15  ;;  %v316_v21 = vsub.f32 %v298_v41, %v312_v16 }
 0x277   :  { %v353_v22 = vsel %vm348_vm3, %v223_v17, 0 }
 0x278   :  { %v345_v23 = vsel %vm220_vm2, %v315_v18, %v1734_v20  ;;  %v346_v12 = vsel %vm220_vm2, %v316_v21, %v1735_v19  ;;  %1630 = vmatpush3.bf16.xpose.msra.mxu1 %v353_v22  ;;  %1642 = vmatpush3.bf16.xpose.msra.mxu0 %v353_v22 }
 0x279   :  { %v347_v14 = vpack.c.bf16 %v346_v12, %v345_v23  ;;  %1653 = vmatprep.subr.bf16.mxu0 %v1909_v7  ;;  %1635 = vmatprep.subr.bf16.mxu1 %v1909_v7  ;;  %v1738_v40 = vpop.permute.xlu0 %1737 }
 0x27a   :  { %v1740_v26 = vunpack.i.h.bf16 %v1738_v40  ;;  %v1739_v27 = vunpack.i.l.bf16 %v1738_v40 }
 0x27d   :  { %v1743_v37 = vpop.permute.xlu1 %1742 }
 0x27e   :  { %v1745_v24 = vunpack.i.h.bf16 %v1743_v37  ;;  %v1744_v25 = vunpack.i.l.bf16 %v1743_v37 }
 0x27f   :  { %1632 = vmatmul.mubr.msk.bf16.vlgmr.msra.gmra.mrb[0].mxu1 %vm348_vm3, %v347_v14 }
 0x280   :  { %1637 = vmatprep.mubr.msk.bf16.mxu1 %vm1910_vm1, %v1909_v7  ;;  %v292_v43 = vsel %vm220_vm2, %v1739_v27, %v1744_v25  ;;  %v293_v44 = vsel %vm220_vm2, %v1740_v26, %v1745_v24 }
 0x281   :  { %v1748_v28 = vpop.permute.xlu0 %1747  ;;  %v294_v48 = vpack.c.bf16 %v293_v44, %v292_v43 }
 0x282   :  { %v1750_v46 = vunpack.i.h.bf16 %v1748_v28  ;;  %v1749_v47 = vunpack.i.l.bf16 %v1748_v28 }
 0x283   :  { %v724_v32 = vsel %vm348_vm3, %v294_v48, 0 }
 0x285   :  { %v1753_v45 = vpop.permute.xlu1 %1752 }
 0x286   :  { %v1755_v29 = vunpack.i.h.bf16 %v1753_v45  ;;  %v1754_v30 = vunpack.i.l.bf16 %v1753_v45 }
 0x288   :  { %v535_v49 = vsel %vm220_vm2, %v1749_v47, %v1754_v30  ;;  %v536_v50 = vsel %vm220_vm2, %v1750_v46, %v1755_v29 }
 0x289   :  { %v537_v51 = vpack.c.bf16 %v536_v50, %v535_v49  ;;  %v1758_v31 = vpop.permute.xlu0 %1757 }
 0x28a   :  { %v1760_v54 = vunpack.i.h.bf16 %v1758_v31  ;;  %v1759_v55 = vunpack.i.l.bf16 %v1758_v31 }
 0x28b   :  { %1644 = vmatmul.mubr.msk.bf16.vlgmr.msra.gmra.mrb[4].mxu0 %vm348_vm3, %v537_v51 }
 0x28c   :  { %1654 = vmatpush3.bf16.xpose.msra.mxu0 %v724_v32  ;;  %1655 = vmatprep.mubr.msk.bf16.mxu0 %vm1910_vm1, %v1909_v7 }
 0x28d   :  { %v1763_v53 = vpop.permute.xlu1 %1762  ;;  %1665 = vmatprep.subr.bf16.mxu0 %v1909_v7 }
 0x28e   :  { %v1765_v56 = vunpack.i.h.bf16 %v1763_v53  ;;  %v1764_v57 = vunpack.i.l.bf16 %v1763_v53 }
 0x290   :  { %v717_v33 = vsel %vm220_vm2, %v1759_v55, %v1764_v57  ;;  %v718_v34 = vsel %vm220_vm2, %v1760_v54, %v1765_v56 }
 0x291   :  { %v719_v58 = vpack.c.bf16 %v718_v34, %v717_v33  ;;  %v1768_v59 = vpop.permute.xlu0 %1767 }
 0x292   :  { %v1770_v61 = vunpack.i.h.bf16 %v1768_v59  ;;  %v1769_v62 = vunpack.i.l.bf16 %v1768_v59 }
 0x293   :  { %1656 = vmatmul.mubr.msk.bf16.vlgmr.msra.gmra.mrb[8].mxu0 %vm348_vm3, %v719_v58 }
 0x294   :  { %1666 = vmatpush3.bf16.xpose.msra.mxu0 %v724_v32  ;;  %1667 = vmatprep.mubr.msk.bf16.mxu0 %vm1910_vm1, %v1909_v7 }
 0x295   :  { %v1773_v60 = vpop.permute.xlu1 %1772  ;;  %1677 = vmatprep.subr.bf16.mxu0 %v1909_v7 }
 0x296   :  { %v1775_v35 = vunpack.i.h.bf16 %v1773_v60  ;;  %v1774_v36 = vunpack.i.l.bf16 %v1773_v60 }
 0x298   :  { %v905_v63 = vsel %vm220_vm2, %v1769_v62, %v1774_v36  ;;  %v906_v0 = vsel %vm220_vm2, %v1770_v61, %v1775_v35 }
 0x299   :  { %v907_v1 = vpack.c.bf16 %v906_v0, %v905_v63 }
 0x29b   :  { %1668 = vmatmul.mubr.msk.bf16.vlgmr.msra.gmra.mrb[12].mxu0 %vm348_vm3, %v907_v1 }
 0x29c   :  { %1685 = vmatprep.mubr.msk.bf16.mxu0 %vm1910_vm1, %v1909_v7 }
 0x352   :  { %v389_v3 = vpop.f32.mrb[0].mxu1 }
 0x353   :  { %v390_v39 = vadd.f32 %v389_v3, %v295_v2  ;;  %v1633_v4 = vpop.f32.mrb[1].mxu1 }
 0x354   :  { %v392_v11 = vpop.f32.mrb[2].mxu1 }
 0x355   :  { %v393_v5 = vadd.f32 %v392_v11, %v296_v38  ;;  %v1634_v6 = vpop.f32.mrb[3].mxu1  ;;  %v396_v13 = vsel %vm348_vm3, %v390_v39, -inf }
 0x356   :  { %397 = vmax.xlane.f32.xlu0 %v396_v13 }
 0x357   :  { %v399_v42 = vsel %vm348_vm3, %v393_v5, -inf }
 0x358   :  { %400 = vmax.xlane.f32.xlu1 %v399_v42 }
 0x35e   :  { %v575_v8 = vpop.f32.mrb[4].mxu0 }
 0x35f   :  { %v576_v41 = vadd.f32 %v575_v8, %v295_v2  ;;  %v1645_v9 = vpop.f32.mrb[5].mxu0 }
 0x360   :  { %v578_v10 = vpop.f32.mrb[6].mxu0 }
 0x361   :  { %v579_v15 = vadd.f32 %v578_v10, %v296_v38  ;;  %v1646_v16 = vpop.f32.mrb[7].mxu0  ;;  %v582_v17 = vsel %vm348_vm3, %v576_v41, -inf }
 0x362   :  { %583 = vmax.xlane.f32.xlu0 %v582_v17 }
 0x363   :  { %v585_v18 = vsel %vm348_vm3, %v579_v15, -inf }
 0x366   :  { %v760_v19 = vpop.f32.mrb[8].mxu0  ;;  %586 = vmax.xlane.f32.xlu0 %v585_v18 }
 0x367   :  { %v761_v20 = vadd.f32 %v760_v19, %v295_v2  ;;  %v1657_v21 = vpop.f32.mrb[9].mxu0 }
 0x368   :  { %v763_v22 = vpop.f32.mrb[10].mxu0 }
 0x369   :  { %v764_v23 = vadd.f32 %v763_v22, %v296_v38  ;;  %v1658_v12 = vpop.f32.mrb[11].mxu0  ;;  %v767_v14 = vsel %vm348_vm3, %v761_v20, -inf }
 0x36a   :  { %768 = vmax.xlane.f32.xlu1 %v767_v14 }
 0x36b   :  { %v770_v37 = vsel %vm348_vm3, %v764_v23, -inf }
 0x36c   :  { %771 = vmax.xlane.f32.xlu0 %v770_v37 }
 0x36e   :  { %v945_v40 = vpop.f32.mrb[12].mxu0 }
 0x36f   :  { %v946_v24 = vadd.f32 %v945_v40, %v295_v2  ;;  %v1669_v25 = vpop.f32.mrb[13].mxu0 }
 0x370   :  { %v948_v26 = vpop.f32.mrb[14].mxu0 }
 0x371   :  { %v949_v27 = vadd.f32 %v948_v26, %v296_v38  ;;  %v1670_v28 = vpop.f32.mrb[15].mxu0  ;;  %v952_v43 = vsel %vm348_vm3, %v946_v24, -inf }
 0x372   :  { %953 = vmax.xlane.f32.xlu1 %v952_v43 }
 0x373   :  { %v955_v44 = vsel %vm348_vm3, %v949_v27, -inf }
 0x374   :  { %956 = vmax.xlane.f32.xlu0 %v955_v44 }
 0x3e3   :  { %v398_v45 = vpop.xlane.xlu0 %397 }
 0x3e4   :  { %v402_v46 = vsub.f32 %v390_v39, %v398_v45 }
 0x3e5   :  { %v401_v47 = vpop.xlane.xlu1 %400 }
 0x3e6   :  { %v404_v29 = vmul.f32 1.442695, %v402_v46  ;;  %v403_v30 = vsub.f32 %v393_v5, %v401_v47 }
 0x3e8   :  { %1831 = vpow2.f32 %v404_v29  ;;  %v406_v48 = vmul.f32 1.442695, %v403_v30 }
 0x3ea   :  { %1833 = vpow2.f32 %v406_v48 }
 0x3ef   :  { %v584_v49 = vpop.xlane.xlu0 %583 }
 0x3f0   :  { %v588_v50 = vsub.f32 %v576_v41, %v584_v49 }
 0x3f2   :  { %v1832_v51 = vpop.eup %1831  ;;  %v590_v31 = vmul.f32 1.442695, %v588_v50 }
 0x3f3   :  { %v587_v32 = vpop.xlane.xlu0 %586  ;;  %v408_v53 = vsel %vm348_vm3, %v1832_v51, 0.0 }
 0x3f4   :  { %v1834_v54 = vpop.eup %1833  ;;  %1835 = vpow2.f32 %v590_v31  ;;  %v589_v55 = vsub.f32 %v579_v15, %v587_v32  ;;  %409 = vadd.xlane.f32.xlu1 %v408_v53  ;;  %v1795_v32 = vld [vmem:[%s2476_s2] sm:$0xff]  }
 0x3f5   :  { %v411_v56 = vsel %vm348_vm3, %v1834_v54, 0.0  ;;  %1678 = vmatpush3.bf16.msra.mxu0 %v1795_v32 }
 0x3f6   :  { %v592_v57 = vmul.f32 1.442695, %v589_v55  ;;  %412 = vadd.xlane.f32.xlu0 %v411_v56  ;;  %1679 = vmatprep.subr.bf16.mxu0 %v1909_v7 }
 0x3f7   :  { %v769_v33 = vpop.xlane.xlu1 %768 }
 0x3f8   :  { %1837 = vpow2.f32 %v592_v57  ;;  %v773_v34 = vsub.f32 %v761_v20, %v769_v33  ;;  %v1796_v57 = vld [vmem:[%s2476_s2 + $0x8] sm:$0xff]  }
 0x3f9   :  { %v772_v58 = vpop.xlane.xlu0 %771  ;;  %1680 = vmatpush3.bf16.msra.mxu0 %v1796_v57 }
 0x3fa   :  { %v775_v59 = vmul.f32 1.442695, %v773_v34  ;;  %v774_v60 = vsub.f32 %v764_v23, %v772_v58  ;;  %v1797_v58 = vld [vmem:[%s2476_s2 + $0x10] sm:$0xff]   ;;  %1681 = vmatprep.subr.bf16.mxu0 %v1909_v7 }
 0x3fc   :  { %1839 = vpow2.f32 %v775_v59  ;;  %v777_v61 = vmul.f32 1.442695, %v774_v60 }
 0x3fd   :  { %1682 = vmatpush3.bf16.msra.mxu0 %v1797_v58 }
 0x3fe   :  { %v1836_v62 = vpop.eup %1835  ;;  %1841 = vpow2.f32 %v777_v61  ;;  %1683 = vmatprep.subr.bf16.mxu0 %v1909_v7 }
 0x3ff   :  { %v954_v35 = vpop.xlane.xlu1 %953  ;;  %v594_v36 = vsel %vm348_vm3, %v1836_v62, 0.0 }
 0x400   :  { %v958_v63 = vsub.f32 %v946_v24, %v954_v35  ;;  %595 = vadd.xlane.f32.xlu1 %v594_v36  ;;  %v1798_v36 = vld [vmem:[%s2476_s2 + $0x18] sm:$0xff]  }
 0x401   :  { %v957_v0 = vpop.xlane.xlu0 %956  ;;  %1684 = vmatpush3.bf16.msra.mxu0 %v1798_v36  ;;  %v1817_v36 = vld [vmem:[%s2478_s4 + $0x10] sm:$0xff]  }
 0x402   :  { %v1838_v1 = vpop.eup %1837  ;;  %v960_v2 = vmul.f32 1.442695, %v958_v63  ;;  %v959_v3 = vsub.f32 %v949_v27, %v957_v0 }
 0x403   :  { %v597_v38 = vsel %vm348_vm3, %v1838_v1, 0.0 }
 0x404   :  { %1843 = vpow2.f32 %v960_v2  ;;  %v962_v39 = vmul.f32 1.442695, %v959_v3  ;;  %598 = vadd.xlane.f32.xlu0 %v597_v38 }
 0x406   :  { %v1840_v4 = vpop.eup %1839  ;;  %1845 = vpow2.f32 %v962_v39 }
 0x407   :  { %v779_v11 = vsel %vm348_vm3, %v1840_v4, 0.0 }
 0x408   :  { %v1842_v5 = vpop.eup %1841  ;;  %780 = vadd.xlane.f32.xlu1 %v779_v11 }
 0x409   :  { %v782_v6 = vsel %vm348_vm3, %v1842_v5, 0.0 }
 0x40a   :  { %783 = vadd.xlane.f32.xlu0 %v782_v6 }
 0x40e   :  { %v1844_v13 = vpop.eup %1843 }
 0x40f   :  { %v964_v42 = vsel %vm348_vm3, %v1844_v13, 0.0 }
 0x410   :  { %v1846_v8 = vpop.eup %1845  ;;  %965 = vadd.xlane.f32.xlu1 %v964_v42 }
 0x411   :  { %v967_v41 = vsel %vm348_vm3, %v1846_v8, 0.0 }
 0x412   :  { %968 = vadd.xlane.f32.xlu0 %v967_v41 }
 0x421   :  { %420 = vrot.lane.b32.xlu1 %v2149_v52, %s1920_s19 }
 0x428   :  { %790 = vrot.lane.b32.xlu0 %v2149_v52, %s1919_s18 }
 0x481   :  { %v410_v10 = vpop.xlane.xlu1 %409 }
 0x483   :  { %v413_v9 = vpop.xlane.xlu0 %412 }
 0x484   :  { %1847 = vrcp.f32 %v413_v9 }
 0x485   :  { %1849 = vrcp.f32 %v410_v10 }
 0x48d   :  { %v596_v15 = vpop.xlane.xlu1 %595 }
 0x48e   :  { %v1848_v18 = vpop.eup %1847 }
 0x48f   :  { %v1850_v20 = vpop.eup %1849  ;;  %v417_v21 = vmul.f32 %v1848_v18, %v1834_v54 }
 0x490   :  { %v416_v23 = vmul.f32 %v1850_v20, %v1832_v51  ;;  %v1883_v20 = vld [vmem:[%s2474_s0] sm:$0xff] }
 0x491   :  { %v599_v16 = vpop.xlane.xlu0 %598 }
 0x492   :  { %1851 = vrcp.f32 %v599_v16  ;;  %v418_v14 = vpack.c.bf16 %v417_v21, %v416_v23 }
 0x493   :  { %1853 = vrcp.f32 %v596_v15 }
 0x495   :  { %v781_v17 = vpop.xlane.xlu1 %780 }
 0x497   :  { %v784_v22 = vpop.xlane.xlu0 %783 }
 0x498   :  { %1855 = vrcp.f32 %v784_v22 }
 0x499   :  { %1857 = vrcp.f32 %v781_v17 }
 0x49c   :  { %v1852_v52 = vpop.eup %1851 }
 0x49d   :  { %v966_v19 = vpop.xlane.xlu1 %965  ;;  %v1854_v37 = vpop.eup %1853  ;;  %v603_v40 = vmul.f32 %v1852_v52, %v1838_v1 }
 0x49e   :  { %v602_v25 = vmul.f32 %v1854_v37, %v1836_v62 }
 0x49f   :  { %v969_v24 = vpop.xlane.xlu0 %968 }
 0x4a0   :  { %1859 = vrcp.f32 %v969_v24  ;;  %v604_v26 = vpack.c.bf16 %v603_v40, %v602_v25 }
 0x4a1   :  { %v421_v12 = vpop.permute.xlu1 %420  ;;  %1861 = vrcp.f32 %v966_v19 }
 0x4a2   :  { %1636 = vmatpush3.bf16.msra.mxu1 %v421_v12  ;;  %v1856_v27 = vpop.eup %1855 }
 0x4a3   :  { %1647 = vmatprep.subr.bf16.mxu1 %v1909_v7  ;;  %v791_v28 = vpop.permute.xlu0 %790  ;;  %v1858_v43 = vpop.eup %1857  ;;  %v788_v44 = vmul.f32 %v1856_v27, %v1842_v5  ;;  %v1799_v27 = vld [vmem:[%s2477_s3] ss:$12 sps:$4 sm:$0xff]  }
 0x4a4   :  { %v787_v45 = vmul.f32 %v1858_v43, %v1840_v4  ;;  %v1802_v43 = vld [vmem:[%s2477_s3 + $0x18] ss:$12 sps:$4 sm:$0xff]  }
 0x4a5   :  { %1638 = vmatmul.mubr.msk.bf16.vlgmr.msra.gmra.mrb[4].mxu1 %vm348_vm3, %v418_v14 }
 0x4a6   :  { %1648 = vmatpush3.bf16.msra.mxu1 %v421_v12  ;;  %1649 = vmatprep.mubr.msk.bf16.mxu1 %vm1910_vm1, %v1909_v7  ;;  %v789_v46 = vpack.c.bf16 %v788_v44, %v787_v45  ;;  %v1884_v12 = vld [vmem:[%s2474_s0 + $0x8] sm:$0xff]  ;;  %v1807_v44 = vld [vmem:[%s2477_s3 + $0x34] ss:$12 sps:$4 sm:$0xff]   ;;  %v1926_v45 = vmov 0  }
 0x4a7   :  { %1659 = vmatprep.subr.bf16.mxu1 %v1909_v7 }
 0x4aa   :  { %v1860_v47 = vpop.eup %1859 }
 0x4ab   :  { %v1862_v29 = vpop.eup %1861  ;;  %v973_v30 = vmul.f32 %v1860_v47, %v1846_v8  ;;  %v1810_v47 = vld [vmem:[%s2477_s3 + $0x4c] ss:$12 sps:$4 sm:$0xff]  }
 0x4ac   :  { %v972_v48 = vmul.f32 %v1862_v29, %v1844_v13  ;;  %v1808_v29 = vld [vmem:[%s2477_s3 + $0x48] ss:$12 sps:$4 sm:$0xff]  }
 0x4ad   :  { %1650 = vmatmul.mubr.msk.bf16.vlgmr.msra.gmra.mrb[8].mxu1 %vm348_vm3, %v604_v26  ;;  %v1801_v26 = vld [vmem:[%s2477_s3 + $0x4] ss:$12 sps:$4 sm:$0xff]  }
 0x4ae   :  { %1660 = vmatpush3.bf16.msra.mxu1 %v791_v28  ;;  %1661 = vmatprep.mubr.msk.bf16.mxu1 %vm1910_vm1, %v1909_v7  ;;  %v974_v49 = vpack.c.bf16 %v973_v30, %v972_v48 }
 0x4af   :  { %1671 = vmatprep.subr.bf16.mxu1 %v1909_v7  ;;  %1239 = vmatprep.subr.bf16.mxu0 %v1801_v26 }
 0x4b5   :  { %1662 = vmatmul.mubr.msk.bf16.vlgmr.msra.gmra.mrb[12].mxu1 %vm348_vm3, %v789_v46  ;;  %v1805_v46 = vld [vmem:[%s2477_s3 + $0x30] ss:$12 sps:$4 sm:$0xff]  }
 0x4b6   :  { %1672 = vmatpush3.bf16.msra.mxu1 %v791_v28  ;;  %1673 = vmatprep.mubr.msk.bf16.mxu1 %vm1910_vm1, %v1909_v7  ;;  %v1804_v28 = vld [vmem:[%s2477_s3 + $0x1c] ss:$12 sps:$4 sm:$0xff]  }
 0x4b7   :  { %1474 = vmatprep.subr.bf16.mxu1 %v1926_v45 }
 0x4bd   :  { %1674 = vmatmul.mubr.msk.bf16.vlgmr.msra.gmra.mrb[16].mxu1 %vm348_vm3, %v974_v49 }
 0x578   :  { %v460_v50 = vpop.f32.mrb[4].mxu1 }
 0x579   :  { %v1639_v51 = vpop.f32.mrb[5].mxu1 }
 0x57a   :  { %v463_v31 = vpop.f32.mrb[6].mxu1 }
 0x57b   :  { %v1640_v53 = vpop.f32.mrb[7].mxu1 }
 0x580   :  { %v642_v54 = vpop.f32.mrb[8].mxu1 }
 0x581   :  { %v1651_v55 = vpop.f32.mrb[9].mxu1 }
 0x582   :  { %v645_v56 = vpop.f32.mrb[10].mxu1  ;;  %v1554_v55 = vld [vmem:[%s2480_s6] ss:$0 sm:$0xff] }
 0x583   :  { %v1776_v33 = vpack.i.bf16 %v645_v56, %v642_v54  ;;  %v1652_v34 = vpop.f32.mrb[11].mxu1 }
 0x584   :  { %v1811_v34 = vld [vmem:[%s2477_s3 + $0x8] ss:$12 sps:$4 sm:$0xff]  }
 0x585   :  { %1777 = vrot.lane.b32.xlu1 %v1776_v33, %s1919_s18 }
 0x588   :  { %v830_v59 = vpop.f32.mrb[12].mxu1 }
 0x589   :  { %v1663_v60 = vpop.f32.mrb[13].mxu1 }
 0x58a   :  { %v833_v61 = vpop.f32.mrb[14].mxu1  ;;  %v1813_v60 = vld [vmem:[%s2477_s3 + $0x38] ss:$12 sps:$4 sm:$0xff]  }
 0x58b   :  { %v1781_v62 = vpack.i.bf16 %v833_v61, %v830_v59  ;;  %v1664_v35 = vpop.f32.mrb[15].mxu1  ;;  %v1812_v59 = vld [vmem:[%s2477_s3 + $0x20] ss:$12 sps:$4 sm:$0xff]   ;;  %v1814_v61 = vld [vmem:[%s2477_s3 + $0x50] ss:$12 sps:$4 sm:$0xff]  }
 0x58c   :  { %v1816_v35 = vld [vmem:[%s2478_s4 + $0x8] sm:$0xff]  }
 0x58d   :  { %1782 = vrot.lane.b32.xlu1 %v1781_v62, %s1920_s19  ;;  %v1815_v62 = vld [vmem:[%s2478_s4] sm:$0xff]  }
 0x58e   :  { %1475 = vmatpush1.bf16.msra.mxu1 %v1815_v62 }
 0x58f   :  { %1476 = vmatprep.subr.bf16.mxu1 %v1926_v45 }
 0x590   :  { %v1012_v63 = vpop.f32.mrb[16].mxu1 }
 0x591   :  { %v1675_v0 = vpop.f32.mrb[17].mxu1 }
 0x592   :  { %v1015_v1 = vpop.f32.mrb[18].mxu1  ;;  %1477 = vmatpush1.bf16.msra.mxu1 %v1816_v35  ;;  %v1820_v0 = vld [vmem:[%s2478_s4 + $0x28] sm:$0xff]  }
 0x593   :  { %v1786_v2 = vpack.i.bf16 %v1015_v1, %v1012_v63  ;;  %v1676_v3 = vpop.f32.mrb[19].mxu1  ;;  %1478 = vmatprep.subr.bf16.mxu1 %v1926_v45  ;;  %v1819_v63 = vld [vmem:[%s2478_s4 + $0x20] sm:$0xff]   ;;  %v1821_v1 = vld [vmem:[%s2478_s4 + $0x30] sm:$0xff]  }
 0x594   :  { %v1823_v3 = vld [vmem:[%s2478_s4 + $0x40] sm:$0xff]  }
 0x595   :  { %1787 = vrot.lane.b32.xlu0 %v1786_v2, %s1921_s20  ;;  %v1822_v2 = vld [vmem:[%s2478_s4 + $0x38] sm:$0xff]  }
 0x596   :  { %1479 = vmatpush1.bf16.msra.mxu1 %v1817_v36 }
 0x597   :  { %1480 = vmatprep.subr.bf16.mxu1 %v1926_v45 }
 0x5f7   :  { %v1778_v38 = vpop.permute.xlu1 %1777 }
 0x5f8   :  { %v1780_v4 = vunpack.i.h.bf16 %v1778_v38  ;;  %v1779_v11 = vunpack.i.l.bf16 %v1778_v38  ;;  %v1824_v38 = vld [vmem:[%s2478_s4 + $0x48] sm:$0xff]  }
 0x5fa   :  { %v1044_v42 = vsel %vm348_vm3, %v463_v31, %v1780_v4  ;;  %v1043_v8 = vsel %vm348_vm3, %v460_v50, %v1779_v11 }
 0x5ff   :  { %v1783_v39 = vpop.permute.xlu1 %1782 }
 0x600   :  { %v1785_v5 = vunpack.i.h.bf16 %v1783_v39  ;;  %v1784_v6 = vunpack.i.l.bf16 %v1783_v39 }
 0x602   :  { %v1047_v10 = vsel %vm1045_vm4, %v1044_v42, %v1785_v5  ;;  %v1046_v15 = vsel %vm1045_vm4, %v1043_v8, %v1784_v6  ;;  %v1825_v6 = vld [vmem:[%s2478_s4 + $0x50] sm:$0xff]  }
 0x607   :  { %v1788_v13 = vpop.permute.xlu0 %1787 }
 0x608   :  { %v1790_v41 = vunpack.i.h.bf16 %v1788_v13  ;;  %v1789_v9 = vunpack.i.l.bf16 %v1788_v13  ;;  %v1826_v13 = vld [vmem:[%s2478_s4 + $0x58] sm:$0xff]  }
 0x60a   :  { %v1050_v16 = vsel %vm1048_vm5, %v1047_v10, %v1790_v41  ;;  %v1049_v17 = vsel %vm1048_vm5, %v1046_v15, %v1789_v9 }
 0x60b   :  { %v1051_v18 = vpack.c.bf16 %v1050_v16, %v1049_v17 }
 0x60d   :  { %1686 = vmatmul.mubr.msk.bf16.vlgmr.msra.gmra.mrb[16].mxu0 %vm46_vm0, %v1051_v18 }
 0x60e   :  { %1240 = vmatpush1.bf16.msra.mxu0 %v1799_v27  ;;  %1271 = vmatprep.mubr.bf16.mxu0 %v1926_v45 }
 0x60f   :  { %1241 = vmatprep.subr.bf16.mxu0 %v1804_v28 }
 0x612   :  { %1242 = vmatpush1.bf16.msra.mxu0 %v1802_v43 }
 0x613   :  { %1243 = vmatprep.subr.bf16.mxu0 %v1807_v44 }
 0x616   :  { %1244 = vmatpush1.bf16.msra.mxu0 %v1805_v46 }
 0x617   :  { %1245 = vmatprep.subr.bf16.mxu0 %v1810_v47 }
 0x61a   :  { %1246 = vmatpush1.bf16.msra.mxu0 %v1808_v29 }
 0x61b   :  { %1689 = vmatprep.subr.bf16.mxu0 %v1909_v7 }
 0x6e0   :  { %v1121_v19 = vpop.f32.mrb[16].mxu0 }
 0x6e1   :  { %v2339_v21 = vadd.f32 %v1883_v20, %v1121_v19  ;;  %v1687_v22 = vpop.f32.mrb[17].mxu0 }
 0x6e2   :  { %v1124_v23 = vpop.f32.mrb[18].mxu0 }
 0x6e3   :  { %v2344_v14 = vadd.f32 %v1884_v12, %v1124_v23  ;;  %v1688_v52 = vpop.f32.mrb[19].mxu0  ;;  %v1131_v37 = vmul.f32 %v2339_v21, %v2339_v21 }
 0x6e5   :  { %v1133_v40 = vsel %vm46_vm0, %v1131_v37, 0.0  ;;  %v1132_v24 = vmul.f32 %v2344_v14, %v2344_v14 }
 0x6e6   :  { %1134 = vadd.xlane.f32.xlu1 %v1133_v40 }
 0x6e7   :  { %v1136_v25 = vsel %vm46_vm0, %v1132_v24, 0.0 }
 0x6e8   :  { %1137 = vadd.xlane.f32.xlu0 %v1136_v25 }
 0x773   :  { %v1135_v30 = vpop.xlane.xlu1 %1134 }
 0x774   :  { %v1139_v48 = vmul.f32 0.015625, %v1135_v30 }
 0x775   :  { %v1138_v49 = vpop.xlane.xlu0 %1137 }
 0x776   :  { %v1141_v50 = vadd.f32 1e-05, %v1139_v48  ;;  %v1140_v51 = vmul.f32 0.015625, %v1138_v49 }
 0x778   :  { %1863 = vrsqrt.f32 %v1141_v50  ;;  %v1142_v31 = vadd.f32 1e-05, %v1140_v51 }
 0x77a   :  { %1865 = vrsqrt.f32 %v1142_v31 }
 0x782   :  { %v1864_v32 = vpop.eup %1863 }
 0x783   :  { %v1145_v53 = vmul.f32 %v1864_v32, %v2339_v21 }
 0x784   :  { %v1866_v54 = vpop.eup %1865 }
 0x785   :  { %v1146_v56 = vmul.f32 %v1866_v54, %v2344_v14  ;;  %v1153_v57 = vmul.f32 %v1554_v55, %v1145_v53 }
 0x787   :  { %v1154_v33 = vmul.f32 %v1554_v55, %v1146_v56 }
 0x789   :  { %v1155_v58 = vpack.c.bf16 %v1154_v33, %v1153_v57 }
 0x78b   :  { %1567 = vmatmul.mubr.msk.bf16.vlgmr.msra.gmra.mrb[20].mxu0 %vm46_vm0, %v1155_v58 }
 0x78c   :  { %1690 = vmatpush3.bf16.msra.mxu0 %v1811_v34  ;;  %1697 = vmatprep.mubr.msk.bf16.mxu0 %vm1910_vm1, %v1909_v7 }
 0x78d   :  { %1691 = vmatprep.subr.bf16.mxu0 %v1909_v7 }
 0x790   :  { %1692 = vmatpush3.bf16.msra.mxu0 %v1812_v59 }
 0x791   :  { %1693 = vmatprep.subr.bf16.mxu0 %v1909_v7 }
 0x794   :  { %1694 = vmatpush3.bf16.msra.mxu0 %v1813_v60 }
 0x795   :  { %1695 = vmatprep.subr.bf16.mxu0 %v1909_v7  ;;  %v1818_v7 = vld [vmem:[%s2478_s4 + $0x18] sm:$0xff]   ;;  %s1927_s4 = smov [#allocation2]  }
 0x796   :  { %1481 = vmatpush1.bf16.msra.mxu1 %v1818_v7 }
 0x797   :  { %1482 = vmatprep.subr.bf16.mxu1 %v1926_v45 }
 0x798   :  { %1696 = vmatpush3.bf16.msra.mxu0 %v1814_v61 }
 0x79a   :  { %1483 = vmatpush1.bf16.msra.mxu1 %v1819_v63 }
 0x79b   :  { %1698 = vmatmul.mubr.msk.bf16.vlgmr.msra.gmra.mrb[24].mxu0 %vm46_vm0, %v1155_v58  ;;  %1484 = vmatprep.subr.bf16.mxu1 %v1926_v45 }
 0x79e   :  { %1485 = vmatpush1.bf16.msra.mxu1 %v1820_v0 }
 0x79f   :  { %1486 = vmatprep.subr.bf16.mxu1 %v1926_v45 }
 0x7a2   :  { %1487 = vmatpush1.bf16.msra.mxu1 %v1821_v1 }
 0x7a3   :  { %1488 = vmatprep.subr.bf16.mxu1 %v1926_v45 }
 0x7a6   :  { %1489 = vmatpush1.bf16.msra.mxu1 %v1822_v2 }
 0x7a7   :  { %1490 = vmatprep.subr.bf16.mxu1 %v1926_v45 }
 0x7aa   :  { %1491 = vmatpush1.bf16.msra.mxu1 %v1823_v3 }
 0x7ab   :  { %1492 = vmatprep.subr.bf16.mxu1 %v1926_v45 }
 0x7ae   :  { %1493 = vmatpush1.bf16.msra.mxu1 %v1824_v38 }
 0x7af   :  { %1494 = vmatprep.subr.bf16.mxu1 %v1926_v45 }
 0x7b2   :  { %1495 = vmatpush1.bf16.msra.mxu1 %v1825_v6 }
 0x7b3   :  { %1496 = vmatprep.subr.bf16.mxu1 %v1926_v45 }
 0x7b6   :  { %1497 = vmatpush1.bf16.msra.mxu1 %v1826_v13 }
 0x85e   :  { %v1273_v39 = vpop.f32.mrb[20].mxu0 }
 0x85f   :  { %v1275_v4 = vpop.f32.mrb[21].mxu0  ;;  %v1569_v16 = vmul.f32 -1.442695, %v1273_v39 }
 0x860   :  { %1355 = vrot.lane.b32.xlu0 %v1275_v4, %s1917_s16  ;;  %v1277_v11 = vpop.f32.mrb[22].mxu0  ;;  %v1570_v10 = vmul.f32 -1.442695, %v1275_v4 }
 0x861   :  { %v1279_v5 = vpop.f32.mrb[23].mxu0  ;;  %v1571_v17 = vmul.f32 -1.442695, %v1277_v11 }
 0x862   :  { %v1572_v15 = vmul.f32 -1.442695, %v1279_v5  ;;  %1867 = vpow2.f32 %v1570_v10 }
 0x864   :  { %1869 = vpow2.f32 %v1572_v15 }
 0x865   :  { %1871 = vpow2.f32 %v1569_v16 }
 0x866   :  { %1873 = vpow2.f32 %v1571_v17 }
 0x86c   :  { %v1868_v18 = vpop.eup %1867 }
 0x86d   :  { %v1336_v22 = vadd.f32 1.0, %v1868_v18 }
 0x86e   :  { %v1316_v42 = vpop.f32.mrb[24].mxu0  ;;  %v1870_v19 = vpop.eup %1869 }
 0x86f   :  { %1357 = vrot.lane.b32.xlu1 %v1316_v42, %s1917_s16  ;;  %v1699_v8 = vpop.f32.mrb[25].mxu0  ;;  %v1872_v20 = vpop.eup %1871  ;;  %v1338_v12 = vadd.f32 1.0, %v1870_v19  ;;  %1875 = vrcp.f32 %v1336_v22 }
 0x870   :  { %v1319_v41 = vpop.f32.mrb[26].mxu0  ;;  %v1874_v23 = vpop.eup %1873  ;;  %v1335_v52 = vadd.f32 1.0, %v1872_v20 }
 0x871   :  { %1361 = vrot.lane.b32.xlu0 %v1319_v41, %s1917_s16  ;;  %v1700_v9 = vpop.f32.mrb[27].mxu0  ;;  %v1337_v37 = vadd.f32 1.0, %v1874_v23  ;;  %1877 = vrcp.f32 %v1338_v12 }
 0x872   :  { %1879 = vrcp.f32 %v1335_v52 }
 0x873   :  { %1359 = vrot.lane.b32.xlu1 %v1279_v5, %s1917_s16  ;;  %1881 = vrcp.f32 %v1337_v37  ;;  %s1524_s16 = sshll.u32 %s1927_s4, 4  ;;  %s1525_s16 = int_to_ptr.vmem [resolvable:$true] %s1524_s16 }
 0x874   :  { %s1885_s15 = scalar_lea.vmem %s1525_s16, 256  ;;  %p1890_p1 = scmp.lt.s32.totalorder %s1525_s16, %s1525_s16 }
 0x875   :  { %p1886_p0 = scmp.ne.s32.totalorder %s1525_s16, %s1885_s15  ;;  %p1891_p2 = scmp.lt.s32.totalorder %s1885_s15, %s1885_s15 }
 0x877   :  { %p1892_p3 = por %p1891_p2, %p1890_p1 }
 0x879   :  { %v1876_v40 = vpop.eup %1875  ;;  %p1893_p4 = pnand %p1892_p3, %p1886_p0 }
 0x87a   :  { %v1348_v43 = vmul.f32 %v1876_v40, %v1275_v4 }
 0x87b   :  { %v1878_v24 = vpop.eup %1877 }
 0x87c   :  { %v1880_v26 = vpop.eup %1879  ;;  %v1350_v44 = vmul.f32 %v1878_v24, %v1279_v5 }
 0x87d   :  { %v1882_v28 = vpop.eup %1881  ;;  %v1347_v30 = vmul.f32 %v1880_v26, %v1273_v39 }
 0x87e   :  { %v1349_v48 = vmul.f32 %v1882_v28, %v1277_v11 }
 0x8d2   :  { %v1356_v25 = vpop.permute.xlu0 %1355 }
 0x8e1   :  { %v1358_v27 = vpop.permute.xlu1 %1357 }
 0x8e2   :  { %v1363_v46 = vsel %vm46_vm0, %v1356_v25, %v1358_v27  ;;  %v1370_v47 = vmul.f32 %v1358_v27, %v1348_v43 }
 0x8e3   :  { %v1362_v45 = vpop.permute.xlu0 %1361  ;;  %v1369_v31 = vmul.f32 %v1363_v46, %v1347_v30 }
 0x8e4   :  { %v1372_v29 = vmul.f32 %v1362_v45, %v1350_v44 }
 0x8e5   :  { %v1360_v49 = vpop.permute.xlu1 %1359 }
 0x8e6   :  { %v1374_v50 = vpack.c.bf16 %v1372_v29, %v1370_v47  ;;  %v1364_v51 = vsel %vm46_vm0, %v1360_v49, %v1362_v45 }
 0x8e7   :  { %v1371_v32 = vmul.f32 %v1364_v51, %v1349_v48 }
 0x8e8   :  { %1585 = vmatprep.mubr.msk.bf16.mxu1 %vm46_vm0, %v1374_v50 }
 0x8e9   :  { %v1373_v53 = vpack.c.bf16 %v1371_v32, %v1369_v31 }
 0x8eb   :  { %1507 = vmatmul.mubr.bf16.vlgmr.msra.gmra.mrb[20].mxu1 %v1373_v53 }
 0x9be   :  { %v1508_v54 = vpop.f32.mrb[20].mxu1 }
 0x9bf   :  { %v1515_v55 = vadd.f32 %v1508_v54, %v2339_v21  ;;  %v1510_v56 = vpop.f32.mrb[21].mxu1 }
 0x9c0   :  { %v1511_v57 = vpop.f32.mrb[22].mxu1 }
 0x9c1   :  { %1517 = vst.msk [vmem:[#allocation2] sm:$0xff] %vm46_vm0, %v1515_v55  ;;  %v1516_v33 = vadd.f32 %v1511_v57, %v2344_v14  ;;  %v1513_v34 = vpop.f32.mrb[23].mxu1 }
 0x9c3   :  { %1518 = vst.msk [vmem:[#allocation2 + $0x8] sm:$0xff] %vm46_vm0, %v1516_v33 }
 0x9c4   :  { %1896 = shalt.err (!%p1893_p4)
}
 0x9c5   :  { %s1897_s19 = scalar_lea.hbm %s2484_s10, 256 }
 0x9c6   :  { %p1898_p5 = scmp.ne.s32.totalorder %s2484_s10, %s1897_s19  ;;  %p1901_p6 = scmp.lt.u32.totalorder %s1897_s19, %s2484_s10 }
 0x9c8   :  { %p1903_p7 = pnand %p1901_p6, %p1898_p5 }
 0x9ca   :  { %1906 = shalt.err (!%p1903_p7)
}
 0x9cb   :  { %s1928_s5 = smov 128  }
 0x9cc   :  { %1530 = dma.vmem_to_hbm [thread:$0]  %s1525_s16, 256, %s2484_s10, [#allocation3], %s1928_s5, %s1928_s5, %s1914_s14  }
 0x9cd   :  { %1907 = dma.done.wait [#allocation3], 256  }
 0x9ce   :  { %1908 = vsyncadd [#allocation3], 4294967040 }
 0x9cf   :  { %1534 = vsyncpa [#allocation3], 1 }

</bundles_post_ra>
